<compile_context>
chip_gen: v6e
topology: v6e:2x2x1
jax: 0.10.0
libtpu: 0.0.40
codegen_flags: <defaults>
</compile_context>

<pallas_src>
import functools
import math

import jax
import jax.numpy as jnp
from jax.experimental import pallas as pl
from jax.experimental.pallas import tpu as pltpu

D_MODEL = 32
NUM_HEADS = 4
DIM_FF = 64
HEAD_DIM = D_MODEL // NUM_HEADS
LN_EPS = 1e-5


def _layer_norm(x, gamma, beta):
    mu = jnp.mean(x, axis=-1, keepdims=True)
    xc = x - mu
    var = jnp.mean(xc * xc, axis=-1, keepdims=True)
    return xc * jax.lax.rsqrt(var + LN_EPS) * gamma + beta


def encoder_layer_kernel(x_ref, wslab_ref, bslab_ref, w2_ref, vecs_ref, o_ref,
                         *, fuse_wo, lane_dense_out):
    TB, S, D = x_ref.shape
    F = w2_ref.shape[0]
    H = NUM_HEADS
    dh = D // H
    M = TB * S

    x3 = x_ref[...]                       # (TB, S, D) f32
    x = x3.reshape(M, D)                  # collapse leading dims (minor dim unchanged -> cheap)
    xb = x.astype(jnp.bfloat16)           # bf16 operands for the MXU; accumulation stays f32

    # packed, resident weight slab (bf16): [Wq|Wk|Wv | Wo | W1] along lanes (192 >= 128 lanes)
    wslab = wslab_ref[...]
    wqkv = wslab[:, 0:3 * D]              # (D, 3D)
    wo = wslab[:, 3 * D:4 * D]            # (D, D)
    w1 = wslab[:, 4 * D:4 * D + F]        # (D, F)

    bslab = bslab_ref[...]                # (1, 3D + F) f32: [bq|bk|bv | b1]
    bqkv = bslab[:, 0:3 * D]
    b1 = bslab[:, 3 * D:3 * D + F]

    vecs = vecs_ref[...]                  # (6, D) f32: [bo, b2, ln1_g, ln1_b, ln2_g, ln2_b]
    bo, b2 = vecs[0:1, :], vecs[1:2, :]
    g1, be1 = vecs[2:3, :], vecs[3:4, :]
    g2, be2 = vecs[4:5, :], vecs[5:6, :]

    # ---- fused QKV projection: one (M, D) @ (D, 3D) bf16 MXU op, f32 accumulation ----
    qkv = jnp.dot(xb, wqkv, preferred_element_type=jnp.float32) + bqkv
    q = qkv[:, 0 * D:1 * D].reshape(TB, S, D).astype(jnp.bfloat16)
    k = qkv[:, 1 * D:2 * D].reshape(TB, S, D).astype(jnp.bfloat16)
    v = qkv[:, 2 * D:3 * D].reshape(TB, S, D).astype(jnp.bfloat16)

    # ---- multi-head self-attention (softmax kept in f32) ----
    # Heads iterate with 3-D single-leading-batch-dim einsums (the only batched dot_general
    # form Pallas-TPU lowers); the epilogue is fused into one Wo matmul when fuse_wo=True.
    scale = 1.0 / math.sqrt(dh)
    ctx_heads = []
    attn_acc = None
    for h in range(H):                    # static unroll over heads
        sl = slice(h * dh, (h + 1) * dh)
        qh, kh, vh = q[:, :, sl], k[:, :, sl], v[:, :, sl]       # (TB, S, dh) bf16
        s = jnp.einsum('bqd,bkd->bqk', qh, kh,
                       preferred_element_type=jnp.float32) * scale
        s = s - jnp.max(s, axis=-1, keepdims=True)
        p = jnp.exp(s)
        p = p * pl.reciprocal(jnp.sum(p, axis=-1, keepdims=True), approx=True)  # EUP divide
        ctx = jnp.einsum('bqk,bkd->bqd', p.astype(jnp.bfloat16), vh,
                         preferred_element_type=jnp.float32)     # (TB, S, dh) f32
        if fuse_wo:
            ctx_heads.append(ctx)
        else:
            part = jnp.dot(ctx.reshape(M, dh).astype(jnp.bfloat16), wo[sl, :],
                           preferred_element_type=jnp.float32)
            attn_acc = part if attn_acc is None else attn_acc + part

    if fuse_wo:
        # one lane-concat of the head contexts, then a single K=D Wo matmul (review item 1)
        ctx_all = jnp.concatenate(ctx_heads, axis=-1).reshape(M, D)
        attn = jnp.dot(ctx_all.astype(jnp.bfloat16), wo,
                       preferred_element_type=jnp.float32)
    else:
        attn = attn_acc
    attn = attn + bo

    # ---- residual + LayerNorm 1 (f32) ----
    y = _layer_norm(x + attn, g1, be1)

    # ---- feed-forward (bf16 operands, f32 accumulation) ----
    h1 = jnp.dot(y.astype(jnp.bfloat16), w1, preferred_element_type=jnp.float32) + b1
    h1 = jnp.maximum(h1, 0.0)
    ff = jnp.dot(h1.astype(jnp.bfloat16), w2_ref[...],
                 preferred_element_type=jnp.float32) + b2

    # ---- residual + LayerNorm 2 (f32) ----
    z = _layer_norm(y + ff, g2, be2)

    if lane_dense_out:
        # 256-lane rows -> full (unmasked) vector stores instead of 32-lane masked stores
        o_ref[...] = z.reshape(TB, 1, S * D)
    else:
        o_ref[...] = z.reshape(TB, S, D)


def transformer_encoder_layer(x, packed_params, *, block_b=None, rows_per_step=2048,
                              min_grid_steps=2, fuse_wo=True, lane_dense_out=True):
    """x: (B, S, D) f32.  packed_params = (wslab, bslab, w2, vecs) -- see __main__ packing."""
    wslab, bslab, w2, vecs = packed_params
    B, S, D = x.shape

    if block_b is None:
        # Many batch rows per grid step (M = block_b*S) to amortize the ~0.35us/step overhead,
        # but keep >= min_grid_steps grid steps so both v7x TensorCores get sharded work.
        block_b = max(1, min(B, rows_per_step // max(S, 1)))
        if B >= min_grid_steps:
            block_b = min(block_b, pl.cdiv(B, min_grid_steps))
    grid_b = pl.cdiv(B, block_b)
    b_pad = grid_b * block_b
    if b_pad != B:   # awkward / prime B: pad instead of shrinking block_b (review item 8)
        x = jnp.pad(x, ((0, b_pad - B), (0, 0), (0, 0)))

    # Explicit scoped-VMEM budget: double-buffered x/out blocks + resident weight slabs + a
    # generous allowance for in-kernel f32 intermediates.  Re-derive before scaling S / D
    # (v7x has 64 MiB physical VMEM vs 128 MiB on v5e/v6e).
    blk_bytes = block_b * S * D * 4
    w_bytes = sum(int(p.size) * jnp.dtype(p.dtype).itemsize for p in packed_params)
    vmem_limit = 4 * blk_bytes + 2 * w_bytes + 40 * blk_bytes + (1 << 20)
    vmem_limit = int(min(max(vmem_limit, 16 * 1024 * 1024), 32 * 1024 * 1024))

    kernel = functools.partial(encoder_layer_kernel, fuse_wo=fuse_wo,
                               lane_dense_out=lane_dense_out)
    in_specs = [
        pl.BlockSpec((block_b, S, D), lambda b: (b, 0, 0)),
        pl.BlockSpec(wslab.shape, lambda b: (0, 0)),
        pl.BlockSpec(bslab.shape, lambda b: (0, 0)),
        pl.BlockSpec(w2.shape, lambda b: (0, 0)),
        pl.BlockSpec(vecs.shape, lambda b: (0, 0)),
    ]
    if lane_dense_out:
        out_shape = jax.ShapeDtypeStruct((b_pad, 1, S * D), jnp.float32)
        out_spec = pl.BlockSpec((block_b, 1, S * D), lambda b: (b, 0, 0))
    else:
        out_shape = jax.ShapeDtypeStruct((b_pad, S, D), jnp.float32)
        out_spec = pl.BlockSpec((block_b, S, D), lambda b: (b, 0, 0))

    out = pl.pallas_call(
        kernel,
        out_shape=out_shape,
        grid_spec=pltpu.PrefetchScalarGridSpec(
            num_scalar_prefetch=0,
            grid=(grid_b,),
            in_specs=in_specs,
            out_specs=out_spec,
        ),
        compiler_params=pltpu.CompilerParams(
            dimension_semantics=("parallel",),
            vmem_limit_bytes=vmem_limit,
        ),
    )(x, wslab, bslab, w2, vecs)

    out = out.reshape(b_pad, S, D)
    return out if b_pad == B else out[:B]


def reference_layer(x, params):
    (wq, bq, wk, bk, wv, bv, wo, bo, w1, b1, w2, b2, g1, be1, g2, be2) = params
    B, S, D = x.shape
    q = (x @ wq + bq).reshape(B, S, NUM_HEADS, HEAD_DIM).transpose(0, 2, 1, 3)
    k = (x @ wk + bk).reshape(B, S, NUM_HEADS, HEAD_DIM).transpose(0, 2, 1, 3)
    v = (x @ wv + bv).reshape(B, S, NUM_HEADS, HEAD_DIM).transpose(0, 2, 1, 3)
    scores = jnp.einsum("bhqd,bhkd->bhqk", q, k) / math.sqrt(HEAD_DIM)
    p = jax.nn.softmax(scores, axis=-1)
    attn = jnp.einsum("bhqk,bhkd->bhqd", p, v).transpose(0, 2, 1, 3).reshape(B, S, D)
    attn = attn @ wo + bo
    y = x + attn
    y = (y - y.mean(-1, keepdims=True)) * jax.lax.rsqrt(y.var(-1, keepdims=True) + LN_EPS) * g1 + be1
    ff = jnp.maximum(y @ w1 + b1, 0.0) @ w2 + b2
    z = y + ff
    z = (z - z.mean(-1, keepdims=True)) * jax.lax.rsqrt(z.var(-1, keepdims=True) + LN_EPS) * g2 + be2
    return z


if __name__ == "__main__":
    key = jax.random.PRNGKey(0)
    ks = jax.random.split(key, 16)
    B, S, D, F = 2, 8, D_MODEL, DIM_FF

    def lin(kw, kb, d_in, d_out):
        # PyTorch Linear: y = x @ W.T + b ; we store W already transposed -> (d_in, d_out)
        w = jax.random.uniform(kw, (d_in, d_out), jnp.float32, -1.0, 1.0) / math.sqrt(d_in)
        b = jax.random.uniform(kb, (1, d_out), jnp.float32, -1.0, 1.0) / math.sqrt(d_in)
        return w, b

    wq, bq = lin(ks[0], ks[1], D, D)
    wk, bk = lin(ks[2], ks[3], D, D)
    wv, bv = lin(ks[4], ks[5], D, D)
    wo, bo = lin(ks[6], ks[7], D, D)
    w1, b1 = lin(ks[8], ks[9], D, F)
    w2, b2 = lin(ks[10], ks[11], F, D)
    g1, be1 = jnp.ones((1, D), jnp.float32), jnp.zeros((1, D), jnp.float32)
    g2, be2 = jnp.ones((1, D), jnp.float32), jnp.zeros((1, D), jnp.float32)

    # unpacked params (pure-JAX f32 reference)
    params = (wq, bq, wk, bk, wv, bv, wo, bo, w1, b1, w2, b2, g1, be1, g2, be2)

    # packed params for the kernel (review items 5 & 7): bf16 weight slabs, f32 bias/LN vectors
    wqkv = jnp.concatenate([wq, wk, wv], axis=1)                           # (D, 3D)
    bqkv = jnp.concatenate([bq, bk, bv], axis=1)                           # (1, 3D)
    wslab = jnp.concatenate([wqkv, wo, w1], axis=1).astype(jnp.bfloat16)   # (D, 4D+F)
    bslab = jnp.concatenate([bqkv, b1], axis=1)                            # (1, 3D+F)
    vecs = jnp.concatenate([bo, b2, g1, be1, g2, be2], axis=0)             # (6, D)
    packed = (wslab, bslab, w2.astype(jnp.bfloat16), vecs)

    x = jax.random.normal(ks[12], (B, S, D), jnp.float32)
    ref = reference_layer(x, params)

    # bf16 MXU operands (f32 accumulation) -> compare to the f32 reference with a looser
    # tolerance than the previous all-f32 version (per the review's correctness note).
    def run(fuse_wo, lane_dense_out):
        out = jax.block_until_ready(
            transformer_encoder_layer(x, packed, fuse_wo=fuse_wo,
                                      lane_dense_out=lane_dense_out))
        assert out.shape == (B, S, D)
        return out, bool(jnp.allclose(out, ref, atol=5e-2, rtol=5e-2))

    try:
        out, ok = run(fuse_wo=True, lane_dense_out=True)
    except Exception:
        # Lane-dim concatenate / lane-merging reshape lowering is Mosaic-version dependent;
        # fall back to the conservative layout (per-head Wo accumulation, (B,S,D) output).
        ok = False
    if not ok:
        out, ok = run(fuse_wo=False, lane_dense_out=False)
    assert ok, "mismatch vs JAX reference"
    print("KERNEL_OK")
</pallas_src>

<mosaic_0001>
module attributes {stable_mosaic.version = 11 : i64} {
  func.func @encoder_layer_kernel(%arg0: i32, %arg1: memref<1x8x32xf32, #tpu.memory_space<vmem>>, %arg2: memref<32x192xbf16, #tpu.memory_space<vmem>>, %arg3: memref<1x160xf32, #tpu.memory_space<vmem>>, %arg4: memref<64x32xbf16, #tpu.memory_space<vmem>>, %arg5: memref<6x32xf32, #tpu.memory_space<vmem>>, %arg6: memref<1x1x256xf32, #tpu.memory_space<vmem>>) attributes {dimension_semantics = [#tpu.dimension_semantics<parallel>], iteration_bounds = array<i64: 2>, scalar_prefetch = 0 : i64, scratch_operands = 0 : i64, tpu.core_type = #tpu.core_type<tc>, window_params = [{transform_indices = @transform_0, window_bounds = array<i64: 1, 8, 32>}, {pipeline_mode = #tpu.pipeline_mode<synchronous>, transform_indices = @transform_1, window_bounds = array<i64: 32, 192>}, {pipeline_mode = #tpu.pipeline_mode<synchronous>, transform_indices = @transform_2, window_bounds = array<i64: 1, 160>}, {pipeline_mode = #tpu.pipeline_mode<synchronous>, transform_indices = @transform_3, window_bounds = array<i64: 64, 32>}, {pipeline_mode = #tpu.pipeline_mode<synchronous>, transform_indices = @transform_4, window_bounds = array<i64: 6, 32>}, {transform_indices = @transform_5, window_bounds = array<i64: 1, 1, 256>}]} {
    %c0 = arith.constant 0 : index
    %c0_0 = arith.constant 0 : index
    %c0_1 = arith.constant 0 : index
    %0 = vector.load %arg1[%c0, %c0_0, %c0_1] : memref<1x8x32xf32, #tpu.memory_space<vmem>>, vector<1x8x32xf32>
    %1 = vector.shape_cast %0 : vector<1x8x32xf32> to vector<8x32xf32>
    %2 = arith.truncf %1 : vector<8x32xf32> to vector<8x32xbf16>
    %c0_2 = arith.constant 0 : index
    %c0_3 = arith.constant 0 : index
    %3 = vector.load %arg2[%c0_2, %c0_3] : memref<32x192xbf16, #tpu.memory_space<vmem>>, vector<32x192xbf16>
    %4 = vector.extract_strided_slice %3 {offsets = [0, 0], sizes = [32, 96], strides = [1, 1]} : vector<32x192xbf16> to vector<32x96xbf16>
    %5 = vector.extract_strided_slice %3 {offsets = [0, 96], sizes = [32, 32], strides = [1, 1]} : vector<32x192xbf16> to vector<32x32xbf16>
    %6 = vector.extract_strided_slice %3 {offsets = [0, 128], sizes = [32, 64], strides = [1, 1]} : vector<32x192xbf16> to vector<32x64xbf16>
    %c0_4 = arith.constant 0 : index
    %c0_5 = arith.constant 0 : index
    %7 = vector.load %arg3[%c0_4, %c0_5] : memref<1x160xf32, #tpu.memory_space<vmem>>, vector<1x160xf32>
    %8 = vector.extract_strided_slice %7 {offsets = [0, 0], sizes = [1, 96], strides = [1, 1]} : vector<1x160xf32> to vector<1x96xf32>
    %9 = vector.extract_strided_slice %7 {offsets = [0, 96], sizes = [1, 64], strides = [1, 1]} : vector<1x160xf32> to vector<1x64xf32>
    %c0_6 = arith.constant 0 : index
    %c0_7 = arith.constant 0 : index
    %10 = vector.load %arg5[%c0_6, %c0_7] : memref<6x32xf32, #tpu.memory_space<vmem>>, vector<6x32xf32>
    %11 = vector.extract_strided_slice %10 {offsets = [0, 0], sizes = [1, 32], strides = [1, 1]} : vector<6x32xf32> to vector<1x32xf32>
    %12 = vector.extract_strided_slice %10 {offsets = [1, 0], sizes = [1, 32], strides = [1, 1]} : vector<6x32xf32> to vector<1x32xf32>
    %13 = vector.extract_strided_slice %10 {offsets = [2, 0], sizes = [1, 32], strides = [1, 1]} : vector<6x32xf32> to vector<1x32xf32>
    %14 = vector.extract_strided_slice %10 {offsets = [3, 0], sizes = [1, 32], strides = [1, 1]} : vector<6x32xf32> to vector<1x32xf32>
    %15 = vector.extract_strided_slice %10 {offsets = [4, 0], sizes = [1, 32], strides = [1, 1]} : vector<6x32xf32> to vector<1x32xf32>
    %16 = vector.extract_strided_slice %10 {offsets = [5, 0], sizes = [1, 32], strides = [1, 1]} : vector<6x32xf32> to vector<1x32xf32>
    %cst = arith.constant dense<0.000000e+00> : vector<8x96xf32>
    %17 = tpu.matmul %2, %4, %cst {dimension_numbers = #tpu.dot_dimension_numbers<[1], [0], [0], [1], [0, 0, 1, 1], [], []>} : vector<8x32xbf16>, vector<32x96xbf16>, vector<8x96xf32> -> vector<8x96xf32>
    %18 = vector.broadcast %8 : vector<1x96xf32> to vector<8x96xf32>
    %19 = arith.addf %17, %18 : vector<8x96xf32>
    %20 = vector.extract_strided_slice %19 {offsets = [0, 0], sizes = [8, 32], strides = [1, 1]} : vector<8x96xf32> to vector<8x32xf32>
    %21 = vector.shape_cast %20 : vector<8x32xf32> to vector<1x8x32xf32>
    %22 = arith.truncf %21 : vector<1x8x32xf32> to vector<1x8x32xbf16>
    %23 = vector.extract_strided_slice %19 {offsets = [0, 32], sizes = [8, 32], strides = [1, 1]} : vector<8x96xf32> to vector<8x32xf32>
    %24 = vector.shape_cast %23 : vector<8x32xf32> to vector<1x8x32xf32>
    %25 = arith.truncf %24 : vector<1x8x32xf32> to vector<1x8x32xbf16>
    %26 = vector.extract_strided_slice %19 {offsets = [0, 64], sizes = [8, 32], strides = [1, 1]} : vector<8x96xf32> to vector<8x32xf32>
    %27 = vector.shape_cast %26 : vector<8x32xf32> to vector<1x8x32xf32>
    %28 = arith.truncf %27 : vector<1x8x32xf32> to vector<1x8x32xbf16>
    %29 = vector.extract_strided_slice %22 {offsets = [0, 0, 0], sizes = [1, 8, 8], strides = [1, 1, 1]} : vector<1x8x32xbf16> to vector<1x8x8xbf16>
    %30 = vector.extract_strided_slice %25 {offsets = [0, 0, 0], sizes = [1, 8, 8], strides = [1, 1, 1]} : vector<1x8x32xbf16> to vector<1x8x8xbf16>
    %31 = vector.extract_strided_slice %28 {offsets = [0, 0, 0], sizes = [1, 8, 8], strides = [1, 1, 1]} : vector<1x8x32xbf16> to vector<1x8x8xbf16>
    "tpu.trace_start"() <{level = 10 : i32, message = "bqd,bkd->bqk"}> : () -> ()
    %cst_8 = arith.constant dense<0.000000e+00> : vector<1x8x8xf32>
    %32 = tpu.matmul %29, %30, %cst_8 {dimension_numbers = #tpu.dot_dimension_numbers<[2], [2], [1], [1], [0, 0, 0, 1, 1, 1], [0], [0]>} : vector<1x8x8xbf16>, vector<1x8x8xbf16>, vector<1x8x8xf32> -> vector<1x8x8xf32>
    "tpu.trace_stop"() : () -> ()
    %cst_9 = arith.constant 0.353553385 : f32
    %33 = vector.broadcast %cst_9 : f32 to vector<1x8x8xf32>
    %34 = arith.mulf %32, %33 : vector<1x8x8xf32>
    %cst_10 = arith.constant dense<0xFF800000> : vector<1x8xf32>
    %35 = vector.multi_reduction <maximumf>, %34, %cst_10 [2] : vector<1x8x8xf32> to vector<1x8xf32>
    %36 = vector.shape_cast %35 : vector<1x8xf32> to vector<1x8x1xf32>
    %37 = vector.broadcast %36 : vector<1x8x1xf32> to vector<1x8x8xf32>
    %38 = arith.subf %34, %37 : vector<1x8x8xf32>
    %39 = math.exp %38 : vector<1x8x8xf32>
    %cst_11 = arith.constant dense<0.000000e+00> : vector<1x8xf32>
    %40 = vector.multi_reduction <add>, %39, %cst_11 [2] : vector<1x8x8xf32> to vector<1x8xf32>
    %41 = vector.shape_cast %40 : vector<1x8xf32> to vector<1x8x1xf32>
    %42 = tpu.reciprocal %41 {approx = true} : vector<1x8x1xf32> -> vector<1x8x1xf32>
    %43 = vector.broadcast %42 : vector<1x8x1xf32> to vector<1x8x8xf32>
    %44 = arith.mulf %39, %43 : vector<1x8x8xf32>
    %45 = arith.truncf %44 : vector<1x8x8xf32> to vector<1x8x8xbf16>
    "tpu.trace_start"() <{level = 10 : i32, message = "bqk,bkd->bqd"}> : () -> ()
    %cst_12 = arith.constant dense<0.000000e+00> : vector<1x8x8xf32>
    %46 = tpu.matmul %45, %31, %cst_12 {dimension_numbers = #tpu.dot_dimension_numbers<[2], [1], [1], [2], [0, 0, 0, 1, 1, 2], [0], [0]>} : vector<1x8x8xbf16>, vector<1x8x8xbf16>, vector<1x8x8xf32> -> vector<1x8x8xf32>
    "tpu.trace_stop"() : () -> ()
    %47 = vector.extract_strided_slice %22 {offsets = [0, 0, 8], sizes = [1, 8, 8], strides = [1, 1, 1]} : vector<1x8x32xbf16> to vector<1x8x8xbf16>
    %48 = vector.extract_strided_slice %25 {offsets = [0, 0, 8], sizes = [1, 8, 8], strides = [1, 1, 1]} : vector<1x8x32xbf16> to vector<1x8x8xbf16>
    %49 = vector.extract_strided_slice %28 {offsets = [0, 0, 8], sizes = [1, 8, 8], strides = [1, 1, 1]} : vector<1x8x32xbf16> to vector<1x8x8xbf16>
    "tpu.trace_start"() <{level = 10 : i32, message = "bqd,bkd->bqk"}> : () -> ()
    %cst_13 = arith.constant dense<0.000000e+00> : vector<1x8x8xf32>
    %50 = tpu.matmul %47, %48, %cst_13 {dimension_numbers = #tpu.dot_dimension_numbers<[2], [2], [1], [1], [0, 0, 0, 1, 1, 1], [0], [0]>} : vector<1x8x8xbf16>, vector<1x8x8xbf16>, vector<1x8x8xf32> -> vector<1x8x8xf32>
    "tpu.trace_stop"() : () -> ()
    %cst_14 = arith.constant 0.353553385 : f32
    %51 = vector.broadcast %cst_14 : f32 to vector<1x8x8xf32>
    %52 = arith.mulf %50, %51 : vector<1x8x8xf32>
    %cst_15 = arith.constant dense<0xFF800000> : vector<1x8xf32>
    %53 = vector.multi_reduction <maximumf>, %52, %cst_15 [2] : vector<1x8x8xf32> to vector<1x8xf32>
    %54 = vector.shape_cast %53 : vector<1x8xf32> to vector<1x8x1xf32>
    %55 = vector.broadcast %54 : vector<1x8x1xf32> to vector<1x8x8xf32>
    %56 = arith.subf %52, %55 : vector<1x8x8xf32>
    %57 = math.exp %56 : vector<1x8x8xf32>
    %cst_16 = arith.constant dense<0.000000e+00> : vector<1x8xf32>
    %58 = vector.multi_reduction <add>, %57, %cst_16 [2] : vector<1x8x8xf32> to vector<1x8xf32>
    %59 = vector.shape_cast %58 : vector<1x8xf32> to vector<1x8x1xf32>
    %60 = tpu.reciprocal %59 {approx = true} : vector<1x8x1xf32> -> vector<1x8x1xf32>
    %61 = vector.broadcast %60 : vector<1x8x1xf32> to vector<1x8x8xf32>
    %62 = arith.mulf %57, %61 : vector<1x8x8xf32>
    %63 = arith.truncf %62 : vector<1x8x8xf32> to vector<1x8x8xbf16>
    "tpu.trace_start"() <{level = 10 : i32, message = "bqk,bkd->bqd"}> : () -> ()
    %cst_17 = arith.constant dense<0.000000e+00> : vector<1x8x8xf32>
    %64 = tpu.matmul %63, %49, %cst_17 {dimension_numbers = #tpu.dot_dimension_numbers<[2], [1], [1], [2], [0, 0, 0, 1, 1, 2], [0], [0]>} : vector<1x8x8xbf16>, vector<1x8x8xbf16>, vector<1x8x8xf32> -> vector<1x8x8xf32>
    "tpu.trace_stop"() : () -> ()
    %65 = vector.extract_strided_slice %22 {offsets = [0, 0, 16], sizes = [1, 8, 8], strides = [1, 1, 1]} : vector<1x8x32xbf16> to vector<1x8x8xbf16>
    %66 = vector.extract_strided_slice %25 {offsets = [0, 0, 16], sizes = [1, 8, 8], strides = [1, 1, 1]} : vector<1x8x32xbf16> to vector<1x8x8xbf16>
    %67 = vector.extract_strided_slice %28 {offsets = [0, 0, 16], sizes = [1, 8, 8], strides = [1, 1, 1]} : vector<1x8x32xbf16> to vector<1x8x8xbf16>
    "tpu.trace_start"() <{level = 10 : i32, message = "bqd,bkd->bqk"}> : () -> ()
    %cst_18 = arith.constant dense<0.000000e+00> : vector<1x8x8xf32>
    %68 = tpu.matmul %65, %66, %cst_18 {dimension_numbers = #tpu.dot_dimension_numbers<[2], [2], [1], [1], [0, 0, 0, 1, 1, 1], [0], [0]>} : vector<1x8x8xbf16>, vector<1x8x8xbf16>, vector<1x8x8xf32> -> vector<1x8x8xf32>
    "tpu.trace_stop"() : () -> ()
    %cst_19 = arith.constant 0.353553385 : f32
    %69 = vector.broadcast %cst_19 : f32 to vector<1x8x8xf32>
    %70 = arith.mulf %68, %69 : vector<1x8x8xf32>
    %cst_20 = arith.constant dense<0xFF800000> : vector<1x8xf32>
    %71 = vector.multi_reduction <maximumf>, %70, %cst_20 [2] : vector<1x8x8xf32> to vector<1x8xf32>
    %72 = vector.shape_cast %71 : vector<1x8xf32> to vector<1x8x1xf32>
    %73 = vector.broadcast %72 : vector<1x8x1xf32> to vector<1x8x8xf32>
    %74 = arith.subf %70, %73 : vector<1x8x8xf32>
    %75 = math.exp %74 : vector<1x8x8xf32>
    %cst_21 = arith.constant dense<0.000000e+00> : vector<1x8xf32>
    %76 = vector.multi_reduction <add>, %75, %cst_21 [2] : vector<1x8x8xf32> to vector<1x8xf32>
    %77 = vector.shape_cast %76 : vector<1x8xf32> to vector<1x8x1xf32>
    %78 = tpu.reciprocal %77 {approx = true} : vector<1x8x1xf32> -> vector<1x8x1xf32>
    %79 = vector.broadcast %78 : vector<1x8x1xf32> to vector<1x8x8xf32>
    %80 = arith.mulf %75, %79 : vector<1x8x8xf32>
    %81 = arith.truncf %80 : vector<1x8x8xf32> to vector<1x8x8xbf16>
    "tpu.trace_start"() <{level = 10 : i32, message = "bqk,bkd->bqd"}> : () -> ()
    %cst_22 = arith.constant dense<0.000000e+00> : vector<1x8x8xf32>
    %82 = tpu.matmul %81, %67, %cst_22 {dimension_numbers = #tpu.dot_dimension_numbers<[2], [1], [1], [2], [0, 0, 0, 1, 1, 2], [0], [0]>} : vector<1x8x8xbf16>, vector<1x8x8xbf16>, vector<1x8x8xf32> -> vector<1x8x8xf32>
    "tpu.trace_stop"() : () -> ()
    %83 = vector.extract_strided_slice %22 {offsets = [0, 0, 24], sizes = [1, 8, 8], strides = [1, 1, 1]} : vector<1x8x32xbf16> to vector<1x8x8xbf16>
    %84 = vector.extract_strided_slice %25 {offsets = [0, 0, 24], sizes = [1, 8, 8], strides = [1, 1, 1]} : vector<1x8x32xbf16> to vector<1x8x8xbf16>
    %85 = vector.extract_strided_slice %28 {offsets = [0, 0, 24], sizes = [1, 8, 8], strides = [1, 1, 1]} : vector<1x8x32xbf16> to vector<1x8x8xbf16>
    "tpu.trace_start"() <{level = 10 : i32, message = "bqd,bkd->bqk"}> : () -> ()
    %cst_23 = arith.constant dense<0.000000e+00> : vector<1x8x8xf32>
    %86 = tpu.matmul %83, %84, %cst_23 {dimension_numbers = #tpu.dot_dimension_numbers<[2], [2], [1], [1], [0, 0, 0, 1, 1, 1], [0], [0]>} : vector<1x8x8xbf16>, vector<1x8x8xbf16>, vector<1x8x8xf32> -> vector<1x8x8xf32>
    "tpu.trace_stop"() : () -> ()
    %cst_24 = arith.constant 0.353553385 : f32
    %87 = vector.broadcast %cst_24 : f32 to vector<1x8x8xf32>
    %88 = arith.mulf %86, %87 : vector<1x8x8xf32>
    %cst_25 = arith.constant dense<0xFF800000> : vector<1x8xf32>
    %89 = vector.multi_reduction <maximumf>, %88, %cst_25 [2] : vector<1x8x8xf32> to vector<1x8xf32>
    %90 = vector.shape_cast %89 : vector<1x8xf32> to vector<1x8x1xf32>
    %91 = vector.broadcast %90 : vector<1x8x1xf32> to vector<1x8x8xf32>
    %92 = arith.subf %88, %91 : vector<1x8x8xf32>
    %93 = math.exp %92 : vector<1x8x8xf32>
    %cst_26 = arith.constant dense<0.000000e+00> : vector<1x8xf32>
    %94 = vector.multi_reduction <add>, %93, %cst_26 [2] : vector<1x8x8xf32> to vector<1x8xf32>
    %95 = vector.shape_cast %94 : vector<1x8xf32> to vector<1x8x1xf32>
    %96 = tpu.reciprocal %95 {approx = true} : vector<1x8x1xf32> -> vector<1x8x1xf32>
    %97 = vector.broadcast %96 : vector<1x8x1xf32> to vector<1x8x8xf32>
    %98 = arith.mulf %93, %97 : vector<1x8x8xf32>
    %99 = arith.truncf %98 : vector<1x8x8xf32> to vector<1x8x8xbf16>
    "tpu.trace_start"() <{level = 10 : i32, message = "bqk,bkd->bqd"}> : () -> ()
    %cst_27 = arith.constant dense<0.000000e+00> : vector<1x8x8xf32>
    %100 = tpu.matmul %99, %85, %cst_27 {dimension_numbers = #tpu.dot_dimension_numbers<[2], [1], [1], [2], [0, 0, 0, 1, 1, 2], [0], [0]>} : vector<1x8x8xbf16>, vector<1x8x8xbf16>, vector<1x8x8xf32> -> vector<1x8x8xf32>
    "tpu.trace_stop"() : () -> ()
    %101 = tpu.concatenate %46, %64, %82, %100 in 2 : vector<1x8x8xf32>, vector<1x8x8xf32>, vector<1x8x8xf32>, vector<1x8x8xf32> -> vector<1x8x32xf32>
    %102 = vector.shape_cast %101 : vector<1x8x32xf32> to vector<8x32xf32>
    %103 = arith.truncf %102 : vector<8x32xf32> to vector<8x32xbf16>
    %cst_28 = arith.constant dense<0.000000e+00> : vector<8x32xf32>
    %104 = tpu.matmul %103, %5, %cst_28 {dimension_numbers = #tpu.dot_dimension_numbers<[1], [0], [0], [1], [0, 0, 1, 1], [], []>} : vector<8x32xbf16>, vector<32x32xbf16>, vector<8x32xf32> -> vector<8x32xf32>
    %105 = vector.broadcast %11 : vector<1x32xf32> to vector<8x32xf32>
    %106 = arith.addf %104, %105 : vector<8x32xf32>
    %107 = arith.addf %1, %106 : vector<8x32xf32>
    %cst_29 = arith.constant dense<0.000000e+00> : vector<8xf32>
    %108 = vector.multi_reduction <add>, %107, %cst_29 [1] : vector<8x32xf32> to vector<8xf32>
    %109 = vector.shape_cast %108 : vector<8xf32> to vector<8x1xf32>
    %cst_30 = arith.constant 3.200000e+01 : f32
    %110 = vector.broadcast %cst_30 : f32 to vector<8x1xf32>
    %111 = arith.divf %109, %110 : vector<8x1xf32>
    %112 = vector.broadcast %111 : vector<8x1xf32> to vector<8x32xf32>
    %113 = arith.subf %107, %112 : vector<8x32xf32>
    %114 = arith.mulf %113, %113 : vector<8x32xf32>
    %cst_31 = arith.constant dense<0.000000e+00> : vector<8xf32>
    %115 = vector.multi_reduction <add>, %114, %cst_31 [1] : vector<8x32xf32> to vector<8xf32>
    %116 = vector.shape_cast %115 : vector<8xf32> to vector<8x1xf32>
    %cst_32 = arith.constant 3.200000e+01 : f32
    %117 = vector.broadcast %cst_32 : f32 to vector<8x1xf32>
    %118 = arith.divf %116, %117 : vector<8x1xf32>
    %cst_33 = arith.constant 9.99999974E-6 : f32
    %119 = vector.broadcast %cst_33 : f32 to vector<8x1xf32>
    %120 = arith.addf %118, %119 : vector<8x1xf32>
    %121 = math.rsqrt %120 : vector<8x1xf32>
    %122 = vector.broadcast %121 : vector<8x1xf32> to vector<8x32xf32>
    %123 = arith.mulf %113, %122 : vector<8x32xf32>
    %124 = vector.broadcast %13 : vector<1x32xf32> to vector<8x32xf32>
    %125 = arith.mulf %123, %124 : vector<8x32xf32>
    %126 = vector.broadcast %14 : vector<1x32xf32> to vector<8x32xf32>
    %127 = arith.addf %125, %126 : vector<8x32xf32>
    %128 = arith.truncf %127 : vector<8x32xf32> to vector<8x32xbf16>
    %cst_34 = arith.constant dense<0.000000e+00> : vector<8x64xf32>
    %129 = tpu.matmul %128, %6, %cst_34 {dimension_numbers = #tpu.dot_dimension_numbers<[1], [0], [0], [1], [0, 0, 1, 1], [], []>} : vector<8x32xbf16>, vector<32x64xbf16>, vector<8x64xf32> -> vector<8x64xf32>
    %130 = vector.broadcast %9 : vector<1x64xf32> to vector<8x64xf32>
    %131 = arith.addf %129, %130 : vector<8x64xf32>
    %cst_35 = arith.constant 0.000000e+00 : f32
    %132 = vector.broadcast %cst_35 : f32 to vector<8x64xf32>
    %133 = arith.maximumf %131, %132 : vector<8x64xf32>
    %134 = arith.truncf %133 : vector<8x64xf32> to vector<8x64xbf16>
    %c0_36 = arith.constant 0 : index
    %c0_37 = arith.constant 0 : index
    %135 = vector.load %arg4[%c0_36, %c0_37] : memref<64x32xbf16, #tpu.memory_space<vmem>>, vector<64x32xbf16>
    %cst_38 = arith.constant dense<0.000000e+00> : vector<8x32xf32>
    %136 = tpu.matmul %134, %135, %cst_38 {dimension_numbers = #tpu.dot_dimension_numbers<[1], [0], [0], [1], [0, 0, 1, 1], [], []>} : vector<8x64xbf16>, vector<64x32xbf16>, vector<8x32xf32> -> vector<8x32xf32>
    %137 = vector.broadcast %12 : vector<1x32xf32> to vector<8x32xf32>
    %138 = arith.addf %136, %137 : vector<8x32xf32>
    %139 = arith.addf %127, %138 : vector<8x32xf32>
    %cst_39 = arith.constant dense<0.000000e+00> : vector<8xf32>
    %140 = vector.multi_reduction <add>, %139, %cst_39 [1] : vector<8x32xf32> to vector<8xf32>
    %141 = vector.shape_cast %140 : vector<8xf32> to vector<8x1xf32>
    %cst_40 = arith.constant 3.200000e+01 : f32
    %142 = vector.broadcast %cst_40 : f32 to vector<8x1xf32>
    %143 = arith.divf %141, %142 : vector<8x1xf32>
    %144 = vector.broadcast %143 : vector<8x1xf32> to vector<8x32xf32>
    %145 = arith.subf %139, %144 : vector<8x32xf32>
    %146 = arith.mulf %145, %145 : vector<8x32xf32>
    %cst_41 = arith.constant dense<0.000000e+00> : vector<8xf32>
    %147 = vector.multi_reduction <add>, %146, %cst_41 [1] : vector<8x32xf32> to vector<8xf32>
    %148 = vector.shape_cast %147 : vector<8xf32> to vector<8x1xf32>
    %cst_42 = arith.constant 3.200000e+01 : f32
    %149 = vector.broadcast %cst_42 : f32 to vector<8x1xf32>
    %150 = arith.divf %148, %149 : vector<8x1xf32>
    %cst_43 = arith.constant 9.99999974E-6 : f32
    %151 = vector.broadcast %cst_43 : f32 to vector<8x1xf32>
    %152 = arith.addf %150, %151 : vector<8x1xf32>
    %153 = math.rsqrt %152 : vector<8x1xf32>
    %154 = vector.broadcast %153 : vector<8x1xf32> to vector<8x32xf32>
    %155 = arith.mulf %145, %154 : vector<8x32xf32>
    %156 = vector.broadcast %15 : vector<1x32xf32> to vector<8x32xf32>
    %157 = arith.mulf %155, %156 : vector<8x32xf32>
    %158 = vector.broadcast %16 : vector<1x32xf32> to vector<8x32xf32>
    %159 = arith.addf %157, %158 : vector<8x32xf32>
    %160 = vector.shape_cast %159 : vector<8x32xf32> to vector<1x1x256xf32>
    %c0_44 = arith.constant 0 : index
    %c0_45 = arith.constant 0 : index
    %c0_46 = arith.constant 0 : index
    %161 = vector.load %arg6[%c0_44, %c0_45, %c0_46] : memref<1x1x256xf32, #tpu.memory_space<vmem>>, vector<1x1x256xf32>
    tpu.vector_store %arg6[%c0_44, %c0_45, %c0_46], %160 {strides = array<i32>} : memref<1x1x256xf32, #tpu.memory_space<vmem>>, vector<1x1x256xf32>,
    return
  }
  func.func @transform_0(%arg0: i32) -> (i32, i32, i32) {
    %c0_i32 = arith.constant 0 : i32
    %c0_i32_0 = arith.constant 0 : i32
    %c0_i32_1 = arith.constant 0 : i32
    return %arg0, %c0_i32, %c0_i32_0 : i32, i32, i32
  }
  func.func @transform_1(%arg0: i32) -> (i32, i32) {
    %c0_i32 = arith.constant 0 : i32
    %c0_i32_0 = arith.constant 0 : i32
    %c0_i32_1 = arith.constant 0 : i32
    return %c0_i32, %c0_i32_0 : i32, i32
  }
  func.func @transform_2(%arg0: i32) -> (i32, i32) {
    %c0_i32 = arith.constant 0 : i32
    %c0_i32_0 = arith.constant 0 : i32
    %c0_i32_1 = arith.constant 0 : i32
    return %c0_i32, %c0_i32_0 : i32, i32
  }
  func.func @transform_3(%arg0: i32) -> (i32, i32) {
    %c0_i32 = arith.constant 0 : i32
    %c0_i32_0 = arith.constant 0 : i32
    %c0_i32_1 = arith.constant 0 : i32
    return %c0_i32, %c0_i32_0 : i32, i32
  }
  func.func @transform_4(%arg0: i32) -> (i32, i32) {
    %c0_i32 = arith.constant 0 : i32
    %c0_i32_0 = arith.constant 0 : i32
    %c0_i32_1 = arith.constant 0 : i32
    return %c0_i32, %c0_i32_0 : i32, i32
  }
  func.func @transform_5(%arg0: i32) -> (i32, i32, i32) {
    %c0_i32 = arith.constant 0 : i32
    %c0_i32_0 = arith.constant 0 : i32
    %c0_i32_1 = arith.constant 0 : i32
    return %arg0, %c0_i32, %c0_i32_0 : i32, i32, i32
  }
}

module attributes {stable_mosaic.version = 11 : i64} {
  func.func @encoder_layer_kernel(%arg0: i32, %arg1: memref<1x8x32xf32, #tpu.memory_space<vmem>>, %arg2: memref<32x192xbf16, #tpu.memory_space<vmem>>, %arg3: memref<1x160xf32, #tpu.memory_space<vmem>>, %arg4: memref<64x32xbf16, #tpu.memory_space<vmem>>, %arg5: memref<6x32xf32, #tpu.memory_space<vmem>>, %arg6: memref<1x8x32xf32, #tpu.memory_space<vmem>>) attributes {dimension_semantics = [#tpu.dimension_semantics<parallel>], iteration_bounds = array<i64: 2>, scalar_prefetch = 0 : i64, scratch_operands = 0 : i64, tpu.core_type = #tpu.core_type<tc>, window_params = [{transform_indices = @transform_0, window_bounds = array<i64: 1, 8, 32>}, {pipeline_mode = #tpu.pipeline_mode<synchronous>, transform_indices = @transform_1, window_bounds = array<i64: 32, 192>}, {pipeline_mode = #tpu.pipeline_mode<synchronous>, transform_indices = @transform_2, window_bounds = array<i64: 1, 160>}, {pipeline_mode = #tpu.pipeline_mode<synchronous>, transform_indices = @transform_3, window_bounds = array<i64: 64, 32>}, {pipeline_mode = #tpu.pipeline_mode<synchronous>, transform_indices = @transform_4, window_bounds = array<i64: 6, 32>}, {transform_indices = @transform_5, window_bounds = array<i64: 1, 8, 32>}]} {
    %c0 = arith.constant 0 : index
    %c0_0 = arith.constant 0 : index
    %c0_1 = arith.constant 0 : index
    %0 = vector.load %arg1[%c0, %c0_0, %c0_1] : memref<1x8x32xf32, #tpu.memory_space<vmem>>, vector<1x8x32xf32>
    %1 = vector.shape_cast %0 : vector<1x8x32xf32> to vector<8x32xf32>
    %2 = arith.truncf %1 : vector<8x32xf32> to vector<8x32xbf16>
    %c0_2 = arith.constant 0 : index
    %c0_3 = arith.constant 0 : index
    %3 = vector.load %arg2[%c0_2, %c0_3] : memref<32x192xbf16, #tpu.memory_space<vmem>>, vector<32x192xbf16>
    %4 = vector.extract_strided_slice %3 {offsets = [0, 0], sizes = [32, 96], strides = [1, 1]} : vector<32x192xbf16> to vector<32x96xbf16>
    %5 = vector.extract_strided_slice %3 {offsets = [0, 96], sizes = [32, 32], strides = [1, 1]} : vector<32x192xbf16> to vector<32x32xbf16>
    %6 = vector.extract_strided_slice %3 {offsets = [0, 128], sizes = [32, 64], strides = [1, 1]} : vector<32x192xbf16> to vector<32x64xbf16>
    %c0_4 = arith.constant 0 : index
    %c0_5 = arith.constant 0 : index
    %7 = vector.load %arg3[%c0_4, %c0_5] : memref<1x160xf32, #tpu.memory_space<vmem>>, vector<1x160xf32>
    %8 = vector.extract_strided_slice %7 {offsets = [0, 0], sizes = [1, 96], strides = [1, 1]} : vector<1x160xf32> to vector<1x96xf32>
    %9 = vector.extract_strided_slice %7 {offsets = [0, 96], sizes = [1, 64], strides = [1, 1]} : vector<1x160xf32> to vector<1x64xf32>
    %c0_6 = arith.constant 0 : index
    %c0_7 = arith.constant 0 : index
    %10 = vector.load %arg5[%c0_6, %c0_7] : memref<6x32xf32, #tpu.memory_space<vmem>>, vector<6x32xf32>
    %11 = vector.extract_strided_slice %10 {offsets = [0, 0], sizes = [1, 32], strides = [1, 1]} : vector<6x32xf32> to vector<1x32xf32>
    %12 = vector.extract_strided_slice %10 {offsets = [1, 0], sizes = [1, 32], strides = [1, 1]} : vector<6x32xf32> to vector<1x32xf32>
    %13 = vector.extract_strided_slice %10 {offsets = [2, 0], sizes = [1, 32], strides = [1, 1]} : vector<6x32xf32> to vector<1x32xf32>
    %14 = vector.extract_strided_slice %10 {offsets = [3, 0], sizes = [1, 32], strides = [1, 1]} : vector<6x32xf32> to vector<1x32xf32>
    %15 = vector.extract_strided_slice %10 {offsets = [4, 0], sizes = [1, 32], strides = [1, 1]} : vector<6x32xf32> to vector<1x32xf32>
    %16 = vector.extract_strided_slice %10 {offsets = [5, 0], sizes = [1, 32], strides = [1, 1]} : vector<6x32xf32> to vector<1x32xf32>
    %cst = arith.constant dense<0.000000e+00> : vector<8x96xf32>
    %17 = tpu.matmul %2, %4, %cst {dimension_numbers = #tpu.dot_dimension_numbers<[1], [0], [0], [1], [0, 0, 1, 1], [], []>} : vector<8x32xbf16>, vector<32x96xbf16>, vector<8x96xf32> -> vector<8x96xf32>
    %18 = vector.broadcast %8 : vector<1x96xf32> to vector<8x96xf32>
    %19 = arith.addf %17, %18 : vector<8x96xf32>
    %20 = vector.extract_strided_slice %19 {offsets = [0, 0], sizes = [8, 32], strides = [1, 1]} : vector<8x96xf32> to vector<8x32xf32>
    %21 = vector.shape_cast %20 : vector<8x32xf32> to vector<1x8x32xf32>
    %22 = arith.truncf %21 : vector<1x8x32xf32> to vector<1x8x32xbf16>
    %23 = vector.extract_strided_slice %19 {offsets = [0, 32], sizes = [8, 32], strides = [1, 1]} : vector<8x96xf32> to vector<8x32xf32>
    %24 = vector.shape_cast %23 : vector<8x32xf32> to vector<1x8x32xf32>
    %25 = arith.truncf %24 : vector<1x8x32xf32> to vector<1x8x32xbf16>
    %26 = vector.extract_strided_slice %19 {offsets = [0, 64], sizes = [8, 32], strides = [1, 1]} : vector<8x96xf32> to vector<8x32xf32>
    %27 = vector.shape_cast %26 : vector<8x32xf32> to vector<1x8x32xf32>
    %28 = arith.truncf %27 : vector<1x8x32xf32> to vector<1x8x32xbf16>
    %29 = vector.extract_strided_slice %22 {offsets = [0, 0, 0], sizes = [1, 8, 8], strides = [1, 1, 1]} : vector<1x8x32xbf16> to vector<1x8x8xbf16>
    %30 = vector.extract_strided_slice %25 {offsets = [0, 0, 0], sizes = [1, 8, 8], strides = [1, 1, 1]} : vector<1x8x32xbf16> to vector<1x8x8xbf16>
    %31 = vector.extract_strided_slice %28 {offsets = [0, 0, 0], sizes = [1, 8, 8], strides = [1, 1, 1]} : vector<1x8x32xbf16> to vector<1x8x8xbf16>
    "tpu.trace_start"() <{level = 10 : i32, message = "bqd,bkd->bqk"}> : () -> ()
    %cst_8 = arith.constant dense<0.000000e+00> : vector<1x8x8xf32>
    %32 = tpu.matmul %29, %30, %cst_8 {dimension_numbers = #tpu.dot_dimension_numbers<[2], [2], [1], [1], [0, 0, 0, 1, 1, 1], [0], [0]>} : vector<1x8x8xbf16>, vector<1x8x8xbf16>, vector<1x8x8xf32> -> vector<1x8x8xf32>
    "tpu.trace_stop"() : () -> ()
    %cst_9 = arith.constant 0.353553385 : f32
    %33 = vector.broadcast %cst_9 : f32 to vector<1x8x8xf32>
    %34 = arith.mulf %32, %33 : vector<1x8x8xf32>
    %cst_10 = arith.constant dense<0xFF800000> : vector<1x8xf32>
    %35 = vector.multi_reduction <maximumf>, %34, %cst_10 [2] : vector<1x8x8xf32> to vector<1x8xf32>
    %36 = vector.shape_cast %35 : vector<1x8xf32> to vector<1x8x1xf32>
    %37 = vector.broadcast %36 : vector<1x8x1xf32> to vector<1x8x8xf32>
    %38 = arith.subf %34, %37 : vector<1x8x8xf32>
    %39 = math.exp %38 : vector<1x8x8xf32>
    %cst_11 = arith.constant dense<0.000000e+00> : vector<1x8xf32>
    %40 = vector.multi_reduction <add>, %39, %cst_11 [2] : vector<1x8x8xf32> to vector<1x8xf32>
    %41 = vector.shape_cast %40 : vector<1x8xf32> to vector<1x8x1xf32>
    %42 = tpu.reciprocal %41 {approx = true} : vector<1x8x1xf32> -> vector<1x8x1xf32>
    %43 = vector.broadcast %42 : vector<1x8x1xf32> to vector<1x8x8xf32>
    %44 = arith.mulf %39, %43 : vector<1x8x8xf32>
    %45 = arith.truncf %44 : vector<1x8x8xf32> to vector<1x8x8xbf16>
    "tpu.trace_start"() <{level = 10 : i32, message = "bqk,bkd->bqd"}> : () -> ()
    %cst_12 = arith.constant dense<0.000000e+00> : vector<1x8x8xf32>
    %46 = tpu.matmul %45, %31, %cst_12 {dimension_numbers = #tpu.dot_dimension_numbers<[2], [1], [1], [2], [0, 0, 0, 1, 1, 2], [0], [0]>} : vector<1x8x8xbf16>, vector<1x8x8xbf16>, vector<1x8x8xf32> -> vector<1x8x8xf32>
    "tpu.trace_stop"() : () -> ()
    %47 = vector.shape_cast %46 : vector<1x8x8xf32> to vector<8x8xf32>
    %48 = arith.truncf %47 : vector<8x8xf32> to vector<8x8xbf16>
    %49 = vector.extract_strided_slice %5 {offsets = [0, 0], sizes = [8, 32], strides = [1, 1]} : vector<32x32xbf16> to vector<8x32xbf16>
    %cst_13 = arith.constant dense<0.000000e+00> : vector<8x32xf32>
    %50 = tpu.matmul %48, %49, %cst_13 {dimension_numbers = #tpu.dot_dimension_numbers<[1], [0], [0], [1], [0, 0, 1, 1], [], []>} : vector<8x8xbf16>, vector<8x32xbf16>, vector<8x32xf32> -> vector<8x32xf32>
    %51 = vector.extract_strided_slice %22 {offsets = [0, 0, 8], sizes = [1, 8, 8], strides = [1, 1, 1]} : vector<1x8x32xbf16> to vector<1x8x8xbf16>
    %52 = vector.extract_strided_slice %25 {offsets = [0, 0, 8], sizes = [1, 8, 8], strides = [1, 1, 1]} : vector<1x8x32xbf16> to vector<1x8x8xbf16>
    %53 = vector.extract_strided_slice %28 {offsets = [0, 0, 8], sizes = [1, 8, 8], strides = [1, 1, 1]} : vector<1x8x32xbf16> to vector<1x8x8xbf16>
    "tpu.trace_start"() <{level = 10 : i32, message = "bqd,bkd->bqk"}> : () -> ()
    %cst_14 = arith.constant dense<0.000000e+00> : vector<1x8x8xf32>
    %54 = tpu.matmul %51, %52, %cst_14 {dimension_numbers = #tpu.dot_dimension_numbers<[2], [2], [1], [1], [0, 0, 0, 1, 1, 1], [0], [0]>} : vector<1x8x8xbf16>, vector<1x8x8xbf16>, vector<1x8x8xf32> -> vector<1x8x8xf32>
    "tpu.trace_stop"() : () -> ()
    %cst_15 = arith.constant 0.353553385 : f32
    %55 = vector.broadcast %cst_15 : f32 to vector<1x8x8xf32>
    %56 = arith.mulf %54, %55 : vector<1x8x8xf32>
    %cst_16 = arith.constant dense<0xFF800000> : vector<1x8xf32>
    %57 = vector.multi_reduction <maximumf>, %56, %cst_16 [2] : vector<1x8x8xf32> to vector<1x8xf32>
    %58 = vector.shape_cast %57 : vector<1x8xf32> to vector<1x8x1xf32>
    %59 = vector.broadcast %58 : vector<1x8x1xf32> to vector<1x8x8xf32>
    %60 = arith.subf %56, %59 : vector<1x8x8xf32>
    %61 = math.exp %60 : vector<1x8x8xf32>
    %cst_17 = arith.constant dense<0.000000e+00> : vector<1x8xf32>
    %62 = vector.multi_reduction <add>, %61, %cst_17 [2] : vector<1x8x8xf32> to vector<1x8xf32>
    %63 = vector.shape_cast %62 : vector<1x8xf32> to vector<1x8x1xf32>
    %64 = tpu.reciprocal %63 {approx = true} : vector<1x8x1xf32> -> vector<1x8x1xf32>
    %65 = vector.broadcast %64 : vector<1x8x1xf32> to vector<1x8x8xf32>
    %66 = arith.mulf %61, %65 : vector<1x8x8xf32>
    %67 = arith.truncf %66 : vector<1x8x8xf32> to vector<1x8x8xbf16>
    "tpu.trace_start"() <{level = 10 : i32, message = "bqk,bkd->bqd"}> : () -> ()
    %cst_18 = arith.constant dense<0.000000e+00> : vector<1x8x8xf32>
    %68 = tpu.matmul %67, %53, %cst_18 {dimension_numbers = #tpu.dot_dimension_numbers<[2], [1], [1], [2], [0, 0, 0, 1, 1, 2], [0], [0]>} : vector<1x8x8xbf16>, vector<1x8x8xbf16>, vector<1x8x8xf32> -> vector<1x8x8xf32>
    "tpu.trace_stop"() : () -> ()
    %69 = vector.shape_cast %68 : vector<1x8x8xf32> to vector<8x8xf32>
    %70 = arith.truncf %69 : vector<8x8xf32> to vector<8x8xbf16>
    %71 = vector.extract_strided_slice %5 {offsets = [8, 0], sizes = [8, 32], strides = [1, 1]} : vector<32x32xbf16> to vector<8x32xbf16>
    %cst_19 = arith.constant dense<0.000000e+00> : vector<8x32xf32>
    %72 = tpu.matmul %70, %71, %cst_19 {dimension_numbers = #tpu.dot_dimension_numbers<[1], [0], [0], [1], [0, 0, 1, 1], [], []>} : vector<8x8xbf16>, vector<8x32xbf16>, vector<8x32xf32> -> vector<8x32xf32>
    %73 = arith.addf %50, %72 : vector<8x32xf32>
    %74 = vector.extract_strided_slice %22 {offsets = [0, 0, 16], sizes = [1, 8, 8], strides = [1, 1, 1]} : vector<1x8x32xbf16> to vector<1x8x8xbf16>
    %75 = vector.extract_strided_slice %25 {offsets = [0, 0, 16], sizes = [1, 8, 8], strides = [1, 1, 1]} : vector<1x8x32xbf16> to vector<1x8x8xbf16>
    %76 = vector.extract_strided_slice %28 {offsets = [0, 0, 16], sizes = [1, 8, 8], strides = [1, 1, 1]} : vector<1x8x32xbf16> to vector<1x8x8xbf16>
    "tpu.trace_start"() <{level = 10 : i32, message = "bqd,bkd->bqk"}> : () -> ()
    %cst_20 = arith.constant dense<0.000000e+00> : vector<1x8x8xf32>
    %77 = tpu.matmul %74, %75, %cst_20 {dimension_numbers = #tpu.dot_dimension_numbers<[2], [2], [1], [1], [0, 0, 0, 1, 1, 1], [0], [0]>} : vector<1x8x8xbf16>, vector<1x8x8xbf16>, vector<1x8x8xf32> -> vector<1x8x8xf32>
    "tpu.trace_stop"() : () -> ()
    %cst_21 = arith.constant 0.353553385 : f32
    %78 = vector.broadcast %cst_21 : f32 to vector<1x8x8xf32>
    %79 = arith.mulf %77, %78 : vector<1x8x8xf32>
    %cst_22 = arith.constant dense<0xFF800000> : vector<1x8xf32>
    %80 = vector.multi_reduction <maximumf>, %79, %cst_22 [2] : vector<1x8x8xf32> to vector<1x8xf32>
    %81 = vector.shape_cast %80 : vector<1x8xf32> to vector<1x8x1xf32>
    %82 = vector.broadcast %81 : vector<1x8x1xf32> to vector<1x8x8xf32>
    %83 = arith.subf %79, %82 : vector<1x8x8xf32>
    %84 = math.exp %83 : vector<1x8x8xf32>
    %cst_23 = arith.constant dense<0.000000e+00> : vector<1x8xf32>
    %85 = vector.multi_reduction <add>, %84, %cst_23 [2] : vector<1x8x8xf32> to vector<1x8xf32>
    %86 = vector.shape_cast %85 : vector<1x8xf32> to vector<1x8x1xf32>
    %87 = tpu.reciprocal %86 {approx = true} : vector<1x8x1xf32> -> vector<1x8x1xf32>
    %88 = vector.broadcast %87 : vector<1x8x1xf32> to vector<1x8x8xf32>
    %89 = arith.mulf %84, %88 : vector<1x8x8xf32>
    %90 = arith.truncf %89 : vector<1x8x8xf32> to vector<1x8x8xbf16>
    "tpu.trace_start"() <{level = 10 : i32, message = "bqk,bkd->bqd"}> : () -> ()
    %cst_24 = arith.constant dense<0.000000e+00> : vector<1x8x8xf32>
    %91 = tpu.matmul %90, %76, %cst_24 {dimension_numbers = #tpu.dot_dimension_numbers<[2], [1], [1], [2], [0, 0, 0, 1, 1, 2], [0], [0]>} : vector<1x8x8xbf16>, vector<1x8x8xbf16>, vector<1x8x8xf32> -> vector<1x8x8xf32>
    "tpu.trace_stop"() : () -> ()
    %92 = vector.shape_cast %91 : vector<1x8x8xf32> to vector<8x8xf32>
    %93 = arith.truncf %92 : vector<8x8xf32> to vector<8x8xbf16>
    %94 = vector.extract_strided_slice %5 {offsets = [16, 0], sizes = [8, 32], strides = [1, 1]} : vector<32x32xbf16> to vector<8x32xbf16>
    %cst_25 = arith.constant dense<0.000000e+00> : vector<8x32xf32>
    %95 = tpu.matmul %93, %94, %cst_25 {dimension_numbers = #tpu.dot_dimension_numbers<[1], [0], [0], [1], [0, 0, 1, 1], [], []>} : vector<8x8xbf16>, vector<8x32xbf16>, vector<8x32xf32> -> vector<8x32xf32>
    %96 = arith.addf %73, %95 : vector<8x32xf32>
    %97 = vector.extract_strided_slice %22 {offsets = [0, 0, 24], sizes = [1, 8, 8], strides = [1, 1, 1]} : vector<1x8x32xbf16> to vector<1x8x8xbf16>
    %98 = vector.extract_strided_slice %25 {offsets = [0, 0, 24], sizes = [1, 8, 8], strides = [1, 1, 1]} : vector<1x8x32xbf16> to vector<1x8x8xbf16>
    %99 = vector.extract_strided_slice %28 {offsets = [0, 0, 24], sizes = [1, 8, 8], strides = [1, 1, 1]} : vector<1x8x32xbf16> to vector<1x8x8xbf16>
    "tpu.trace_start"() <{level = 10 : i32, message = "bqd,bkd->bqk"}> : () -> ()
    %cst_26 = arith.constant dense<0.000000e+00> : vector<1x8x8xf32>
    %100 = tpu.matmul %97, %98, %cst_26 {dimension_numbers = #tpu.dot_dimension_numbers<[2], [2], [1], [1], [0, 0, 0, 1, 1, 1], [0], [0]>} : vector<1x8x8xbf16>, vector<1x8x8xbf16>, vector<1x8x8xf32> -> vector<1x8x8xf32>
    "tpu.trace_stop"() : () -> ()
    %cst_27 = arith.constant 0.353553385 : f32
    %101 = vector.broadcast %cst_27 : f32 to vector<1x8x8xf32>
    %102 = arith.mulf %100, %101 : vector<1x8x8xf32>
    %cst_28 = arith.constant dense<0xFF800000> : vector<1x8xf32>
    %103 = vector.multi_reduction <maximumf>, %102, %cst_28 [2] : vector<1x8x8xf32> to vector<1x8xf32>
    %104 = vector.shape_cast %103 : vector<1x8xf32> to vector<1x8x1xf32>
    %105 = vector.broadcast %104 : vector<1x8x1xf32> to vector<1x8x8xf32>
    %106 = arith.subf %102, %105 : vector<1x8x8xf32>
    %107 = math.exp %106 : vector<1x8x8xf32>
    %cst_29 = arith.constant dense<0.000000e+00> : vector<1x8xf32>
    %108 = vector.multi_reduction <add>, %107, %cst_29 [2] : vector<1x8x8xf32> to vector<1x8xf32>
    %109 = vector.shape_cast %108 : vector<1x8xf32> to vector<1x8x1xf32>
    %110 = tpu.reciprocal %109 {approx = true} : vector<1x8x1xf32> -> vector<1x8x1xf32>
    %111 = vector.broadcast %110 : vector<1x8x1xf32> to vector<1x8x8xf32>
    %112 = arith.mulf %107, %111 : vector<1x8x8xf32>
    %113 = arith.truncf %112 : vector<1x8x8xf32> to vector<1x8x8xbf16>
    "tpu.trace_start"() <{level = 10 : i32, message = "bqk,bkd->bqd"}> : () -> ()
    %cst_30 = arith.constant dense<0.000000e+00> : vector<1x8x8xf32>
    %114 = tpu.matmul %113, %99, %cst_30 {dimension_numbers = #tpu.dot_dimension_numbers<[2], [1], [1], [2], [0, 0, 0, 1, 1, 2], [0], [0]>} : vector<1x8x8xbf16>, vector<1x8x8xbf16>, vector<1x8x8xf32> -> vector<1x8x8xf32>
    "tpu.trace_stop"() : () -> ()
    %115 = vector.shape_cast %114 : vector<1x8x8xf32> to vector<8x8xf32>
    %116 = arith.truncf %115 : vector<8x8xf32> to vector<8x8xbf16>
    %117 = vector.extract_strided_slice %5 {offsets = [24, 0], sizes = [8, 32], strides = [1, 1]} : vector<32x32xbf16> to vector<8x32xbf16>
    %cst_31 = arith.constant dense<0.000000e+00> : vector<8x32xf32>
    %118 = tpu.matmul %116, %117, %cst_31 {dimension_numbers = #tpu.dot_dimension_numbers<[1], [0], [0], [1], [0, 0, 1, 1], [], []>} : vector<8x8xbf16>, vector<8x32xbf16>, vector<8x32xf32> -> vector<8x32xf32>
    %119 = arith.addf %96, %118 : vector<8x32xf32>
    %120 = vector.broadcast %11 : vector<1x32xf32> to vector<8x32xf32>
    %121 = arith.addf %119, %120 : vector<8x32xf32>
    %122 = arith.addf %1, %121 : vector<8x32xf32>
    %cst_32 = arith.constant dense<0.000000e+00> : vector<8xf32>
    %123 = vector.multi_reduction <add>, %122, %cst_32 [1] : vector<8x32xf32> to vector<8xf32>
    %124 = vector.shape_cast %123 : vector<8xf32> to vector<8x1xf32>
    %cst_33 = arith.constant 3.200000e+01 : f32
    %125 = vector.broadcast %cst_33 : f32 to vector<8x1xf32>
    %126 = arith.divf %124, %125 : vector<8x1xf32>
    %127 = vector.broadcast %126 : vector<8x1xf32> to vector<8x32xf32>
    %128 = arith.subf %122, %127 : vector<8x32xf32>
    %129 = arith.mulf %128, %128 : vector<8x32xf32>
    %cst_34 = arith.constant dense<0.000000e+00> : vector<8xf32>
    %130 = vector.multi_reduction <add>, %129, %cst_34 [1] : vector<8x32xf32> to vector<8xf32>
    %131 = vector.shape_cast %130 : vector<8xf32> to vector<8x1xf32>
    %cst_35 = arith.constant 3.200000e+01 : f32
    %132 = vector.broadcast %cst_35 : f32 to vector<8x1xf32>
    %133 = arith.divf %131, %132 : vector<8x1xf32>
    %cst_36 = arith.constant 9.99999974E-6 : f32
    %134 = vector.broadcast %cst_36 : f32 to vector<8x1xf32>
    %135 = arith.addf %133, %134 : vector<8x1xf32>
    %136 = math.rsqrt %135 : vector<8x1xf32>
    %137 = vector.broadcast %136 : vector<8x1xf32> to vector<8x32xf32>
    %138 = arith.mulf %128, %137 : vector<8x32xf32>
    %139 = vector.broadcast %13 : vector<1x32xf32> to vector<8x32xf32>
    %140 = arith.mulf %138, %139 : vector<8x32xf32>
    %141 = vector.broadcast %14 : vector<1x32xf32> to vector<8x32xf32>
    %142 = arith.addf %140, %141 : vector<8x32xf32>
    %143 = arith.truncf %142 : vector<8x32xf32> to vector<8x32xbf16>
    %cst_37 = arith.constant dense<0.000000e+00> : vector<8x64xf32>
    %144 = tpu.matmul %143, %6, %cst_37 {dimension_numbers = #tpu.dot_dimension_numbers<[1], [0], [0], [1], [0, 0, 1, 1], [], []>} : vector<8x32xbf16>, vector<32x64xbf16>, vector<8x64xf32> -> vector<8x64xf32>
    %145 = vector.broadcast %9 : vector<1x64xf32> to vector<8x64xf32>
    %146 = arith.addf %144, %145 : vector<8x64xf32>
    %cst_38 = arith.constant 0.000000e+00 : f32
    %147 = vector.broadcast %cst_38 : f32 to vector<8x64xf32>
    %148 = arith.maximumf %146, %147 : vector<8x64xf32>
    %149 = arith.truncf %148 : vector<8x64xf32> to vector<8x64xbf16>
    %c0_39 = arith.constant 0 : index
    %c0_40 = arith.constant 0 : index
    %150 = vector.load %arg4[%c0_39, %c0_40] : memref<64x32xbf16, #tpu.memory_space<vmem>>, vector<64x32xbf16>
    %cst_41 = arith.constant dense<0.000000e+00> : vector<8x32xf32>
    %151 = tpu.matmul %149, %150, %cst_41 {dimension_numbers = #tpu.dot_dimension_numbers<[1], [0], [0], [1], [0, 0, 1, 1], [], []>} : vector<8x64xbf16>, vector<64x32xbf16>, vector<8x32xf32> -> vector<8x32xf32>
    %152 = vector.broadcast %12 : vector<1x32xf32> to vector<8x32xf32>
    %153 = arith.addf %151, %152 : vector<8x32xf32>
    %154 = arith.addf %142, %153 : vector<8x32xf32>
    %cst_42 = arith.constant dense<0.000000e+00> : vector<8xf32>
    %155 = vector.multi_reduction <add>, %154, %cst_42 [1] : vector<8x32xf32> to vector<8xf32>
    %156 = vector.shape_cast %155 : vector<8xf32> to vector<8x1xf32>
    %cst_43 = arith.constant 3.200000e+01 : f32
    %157 = vector.broadcast %cst_43 : f32 to vector<8x1xf32>
    %158 = arith.divf %156, %157 : vector<8x1xf32>
    %159 = vector.broadcast %158 : vector<8x1xf32> to vector<8x32xf32>
    %160 = arith.subf %154, %159 : vector<8x32xf32>
    %161 = arith.mulf %160, %160 : vector<8x32xf32>
    %cst_44 = arith.constant dense<0.000000e+00> : vector<8xf32>
    %162 = vector.multi_reduction <add>, %161, %cst_44 [1] : vector<8x32xf32> to vector<8xf32>
    %163 = vector.shape_cast %162 : vector<8xf32> to vector<8x1xf32>
    %cst_45 = arith.constant 3.200000e+01 : f32
    %164 = vector.broadcast %cst_45 : f32 to vector<8x1xf32>
    %165 = arith.divf %163, %164 : vector<8x1xf32>
    %cst_46 = arith.constant 9.99999974E-6 : f32
    %166 = vector.broadcast %cst_46 : f32 to vector<8x1xf32>
    %167 = arith.addf %165, %166 : vector<8x1xf32>
    %168 = math.rsqrt %167 : vector<8x1xf32>
    %169 = vector.broadcast %168 : vector<8x1xf32> to vector<8x32xf32>
    %170 = arith.mulf %160, %169 : vector<8x32xf32>
    %171 = vector.broadcast %15 : vector<1x32xf32> to vector<8x32xf32>
    %172 = arith.mulf %170, %171 : vector<8x32xf32>
    %173 = vector.broadcast %16 : vector<1x32xf32> to vector<8x32xf32>
    %174 = arith.addf %172, %173 : vector<8x32xf32>
    %175 = vector.shape_cast %174 : vector<8x32xf32> to vector<1x8x32xf32>
    %c0_47 = arith.constant 0 : index
    %c0_48 = arith.constant 0 : index
    %c0_49 = arith.constant 0 : index
    %176 = vector.load %arg6[%c0_47, %c0_48, %c0_49] : memref<1x8x32xf32, #tpu.memory_space<vmem>>, vector<1x8x32xf32>
    tpu.vector_store %arg6[%c0_47, %c0_48, %c0_49], %175 {strides = array<i32>} : memref<1x8x32xf32, #tpu.memory_space<vmem>>, vector<1x8x32xf32>,
    return
  }
  func.func @transform_0(%arg0: i32) -> (i32, i32, i32) {
    %c0_i32 = arith.constant 0 : i32
    %c0_i32_0 = arith.constant 0 : i32
    %c0_i32_1 = arith.constant 0 : i32
    return %arg0, %c0_i32, %c0_i32_0 : i32, i32, i32
  }
  func.func @transform_1(%arg0: i32) -> (i32, i32) {
    %c0_i32 = arith.constant 0 : i32
    %c0_i32_0 = arith.constant 0 : i32
    %c0_i32_1 = arith.constant 0 : i32
    return %c0_i32, %c0_i32_0 : i32, i32
  }
  func.func @transform_2(%arg0: i32) -> (i32, i32) {
    %c0_i32 = arith.constant 0 : i32
    %c0_i32_0 = arith.constant 0 : i32
    %c0_i32_1 = arith.constant 0 : i32
    return %c0_i32, %c0_i32_0 : i32, i32
  }
  func.func @transform_3(%arg0: i32) -> (i32, i32) {
    %c0_i32 = arith.constant 0 : i32
    %c0_i32_0 = arith.constant 0 : i32
    %c0_i32_1 = arith.constant 0 : i32
    return %c0_i32, %c0_i32_0 : i32, i32
  }
  func.func @transform_4(%arg0: i32) -> (i32, i32) {
    %c0_i32 = arith.constant 0 : i32
    %c0_i32_0 = arith.constant 0 : i32
    %c0_i32_1 = arith.constant 0 : i32
    return %c0_i32, %c0_i32_0 : i32, i32
  }
  func.func @transform_5(%arg0: i32) -> (i32, i32, i32) {
    %c0_i32 = arith.constant 0 : i32
    %c0_i32_0 = arith.constant 0 : i32
    %c0_i32_1 = arith.constant 0 : i32
    return %arg0, %c0_i32, %c0_i32_0 : i32, i32, i32
  }
}

</mosaic_0001>

<bundles_post_ra>
// kernel: tpu_custom_call.1
= control target key start
LH: loop header
LB: loop body
LE: loop exit
PB: predicated region body
PF: predicated region fallthrough
CT: control target
= control target key end

     0   :  { %10 = vsyncpa [#allocation3], 0  ;;  %s1946_s0 = inlined_call_operand.vmem [shape: f32[2,8,32], index: 0, kind: input, shape index: {}]   ;;  %s1947_s1 = inlined_call_operand.vmem [shape: bf16[32,192], index: 1, kind: input, shape index: {}]   ;;  %s1948_s2 = inlined_call_operand.vmem [shape: f32[1,160], index: 2, kind: input, shape index: {}]   ;;  %s1949_s3 = inlined_call_operand.vmem [shape: bf16[64,32], index: 3, kind: input, shape index: {}]   ;;  %s1950_s4 = inlined_call_operand.hbm [shape: f32[6,32], index: 4, kind: input, shape index: {}]   ;;  %s1951_s5 = inlined_call_operand.hbm [shape: f32[2,8,32], index: 5, kind: output, shape index: {}]  }
   0x1   :  { %11 = vsyncpa [#allocation4], 0 }
   0x2   :  { %13 = vsyncpa [#allocation4 + $0x1], 0  ;;  %s1644_s18 = smov 0   ;;  %s1646_s19 = smov 0  }
   0x3   :  { %s1648_s20 = smov 0   ;;  %s1650_s21 = smov 0  }
   0x4 LB: > { %s1665_s22 = sadd.s32 4294967295, %s1596_s21   ;;  %s1236_s23 = sadd.s32 4294967294, %s1596_s21   ;;  %s1596_s21 = sphi %s1650_s21, %s1959_s21   ;;  %s1592_s20 = sphi %s1648_s20, %s1958_s20   ;;  %s1588_s19 = sphi %s1646_s19, %s1957_s19   ;;  %s1584_s18 = sphi %s1644_s18, %s1956_s18  }
   0x5   : > { %s1669_s24 = sadd.s32 1, %s1596_s21   ;;  %s136_s25 = sadd.s32 1, %s1592_s20 }
   0x6   : > { %s133_s26 = ssub.s32 %s1596_s21, %s1669_s24  ;;  %p146_p0 = scmp.ne.s32.totalorder %s1592_s20, %s1588_s19 }
   0x7   : > { %p134_p1 = scmp.eq.s32.totalorder %s133_s26, 0  ;;  %p147_p2 = scmp.eq.s32.totalorder %s1665_s22, 1 }
   0x8   : > { %p152_p3 = scmp.ne.s32.totalorder %s1588_s19, %s1584_s18  ;;  %p153_p4 = scmp.eq.s32.totalorder %s1236_s23, 1 }
   0x9   : > { %s1680_s27 = scalar_select %p134_p1, %s1592_s20, %s136_s25  }
   0xa   : > { %p1682_p5 = por %p147_p2, %p146_p0  ;;  %p1686_p6 = por %p153_p4, %p152_p3 }
   0xb   : > { %p1237_p7 = scmp.ge.s32.totalorder %s1596_s21, 1  ;;  %p160_p8 = scmp.lt.s32.totalorder %s1596_s21, 3 }
   0xc   : > { %s1953_s29 = scalar_select %p1686_p6, 1, 0 }
   0xd   : > { %p1424_p9 = scmp.eq.s32.totalorder %s1665_s22, 0  ;;  %p1693_p10 = pnand %p1237_p7, %p160_p8 }
   0xe   : > { %s1598_s6 = smov [#allocation2]  }
   0xf   : > { %s182_s7 = sshll.u32 %s1598_s6, 4  ;;  %p1416_p11 = pneg %p1693_p10  ;;  %s183_s7 = int_to_ptr.vmem [resolvable:$true] %s182_s7 }
  0x10   : > { %s1517_s8 = scalar_lea.vmem %s183_s7, 128  ;;  %p1525_p3 = scmp.lt.s32.totalorder %s183_s7, %s183_s7 }
  0x11   : > { %p1417_p12 = pnand %p1424_p9, %p1416_p11  ;;  %p1518_p0 = scmp.ne.s32.totalorder %s183_s7, %s1517_s8 }
  0x12   : > { %p1526_p4 = scmp.lt.s32.totalorder %s1517_s8, %s1517_s8 }
  0x13   : > { %p1508_p13 = pneg %p1417_p12 }
  0x14   : > { %p1527_p6 = por %p1526_p4, %p1525_p3 }
  0x15   : > { %p1520_p1 = pnand %p1518_p0, %p1508_p13 }
  0x17   : > { %p1521_p2 = pneg %p1520_p1 }
  0x19   : > { %p1528_p7 = pnand %p1527_p6, %p1521_p2 }
  0x1b   : > { %1531 = shalt.err (!%p1528_p7)
}
  0x1c   : > { %1419 = dma.hbm_to_vmem [thread:$0]  (!%p1417_p12), %s1950_s4, 128, %s183_s7, [#allocation3]  }
  0x1d   : > { %202 = sbr.rel (%p1693_p10) target bundleno = 3533 (0xdcd), region = 40 }
  0x22   : > { %1575 = dma.done.wait (%p1424_p9), [#allocation3], 128  }
  0x23   : > { %1577 = vsyncadd (%p1424_p9), [#allocation3], 4294967168  ;;  %p229_p8 = scmp.lt.s32.totalorder %s1665_s22, 1  ;;  %v1599_v0 = vmov 0.0   ;;  %vm1600_vm0 = vmmov 0   ;;  %v1724_v1 = vld [vmem:[%s1947_s1 + $0x10] sm:$0xff]  ;;  %v243_v9 = vlaneseq }
  0x24   : > { %1310 = vmatprep.subr.bf16.mxu1 %v1599_v0  ;;  %1314 = vmatprep.mubr.msk.bf16.mxu1 %vm1600_vm0, %v1599_v0  ;;  %v1729_v2 = vld [vmem:[%s1947_s1 + $0x18] sm:$0xff]  ;;  %v1734_v3 = vld [vmem:[%s1947_s1] sm:$0xff]  ;;  %v1741_v5 = vld [vmem:[%s1947_s1 + $0x8] sm:$0xff]  ;;  %vm260_vm1 = vcmask 261120   ;;  %s1601_s10 = smov 120   ;;  %vm308_vm2 = vcmask 64512  }
  0x25   : > { %s230_s11 = scalar_select %p229_p8, %s1665_s22, 1  ;;  %1324 = vmatprep.subr.bf16.mxu0 %v1599_v0  ;;  %1326 = vmatprep.mubr.msk.bf16.mxu0 %vm1600_vm0, %v1599_v0  ;;  %v1245_v4 = vcombine.low %v1724_v1, %v1729_v2  ;;  %v1244_v7 = vcombine.low %v1734_v3, %v1741_v5  ;;  %v1754_v10 = vshrl.u32 %v243_v9, 7  ;;  %v1760_v12 = vld [vmem:[%s1948_s2] sm:$0x3]  ;;  %v1251_v47 = vcombine.low %v1741_v5, %v1741_v5 }
  0x26   : > { %s1604_s13 = smov 64   ;;  %s1605_s14 = smov 56   ;;  %vm373_vm3 = vcmask 1043456   ;;  %vm1082_vm4 = vcmask 523264  }
  0x27   : > { %s1243_s12 = sshll.u32 %s230_s11, 3  ;;  %1311 = vmatpush3.bf16.msra.mxu1 %v1245_v4  ;;  %v245_v11 = vsub.s32 0, %v1754_v10  ;;  %s1602_s11 = smov 96  }
  0x28   : > { %s232_s15 = scalar_lea.vmem %s1946_s0, %s1243_s12  ;;  %1312 = vmatprep.subr.bf16.mxu1 %v1599_v0  ;;  %s1603_s12 = smov 88  }
  0x29   : > { %v1743_v6 = vld [vmem:[%s232_s15] sm:$0xff]  ;;  %v1765_v13 = vrot.slane %v1760_v12, %v245_v11  ;;  %s1606_s15 = smov 80   ;;  %s1607_s16 = smov 32  }
  0x2a   : > { %v235_v8 = vpack.c.bf16 %v1743_v6, %v1743_v6  ;;  %s1608_s17 = smov 112   ;;  %s1609_s23 = smov 72  }
  0x2b   : > { %1313 = vmatpush3.bf16.msra.mxu1 %v1244_v7  ;;  %s1610_s25 = smov 48   ;;  %s1611_s26 = smov 104  }
  0x2c   : > { %1318 = vmatprep.subr.bf16.mxu1 %v1599_v0  ;;  %s1612_s30 = smov 40   ;;  %s1613_s8 = smov [#allocation5]  }
  0x2d   : > { %s1536_s9 = sshll.u32 %s1613_s8, 4  ;;  %s1537_s9 = int_to_ptr.vmem [resolvable:$false] %s1536_s9 }
  0x2e   : > { %1315 = vmatmul.mubr.msk.bf16.vlgmr.msra.gmra.mxu1 %vm260_vm1, %v235_v8 }
  0x2f   : > { %1320 = vmatprep.mubr.msk.bf16.mxu1 %vm1600_vm0, %v1599_v0 }
  0xee   : > { %v298_v14 = vpop.f32.mrf.mxu1 }
  0xef   : > { %v299_v15 = vadd.f32 %v298_v14, %v1765_v13 }
  0xf0   : > { %v1316_v16 = vpop.f32.mrf.mxu1 }
  0xf1   : > { %v1768_v17 = vpack.c.bf16 %v299_v15, %v299_v15 }
  0xf2   : > { %v301_v18 = vpop.f32.mrf.mxu1 }
  0xf3   : > { %418 = vrot.lane.b32.xlu1 %v1768_v17, %s1601_s10  ;;  %306 = vrot.lane.b32.xlu0 %v1768_v17, %s1602_s11 }
  0xf4   : > { %v1317_v19 = vpop.f32.mrf.mxu1 }
  0xf7   : > { %420 = vrot.lane.b32.xlu0 %v1768_v17, %s1603_s12 }
 0x165   : > { %v307_v20 = vpop.permute.xlu0 %306  ;;  %v419_v24 = vpop.permute.xlu1 %418 }
 0x166   : > { %v313_v21 = vsel %vm308_vm2, %v307_v20, 0 }
 0x167   : > { %1319 = vmatpush3.bf16.xpose.msra.mxu1 %v313_v21 }
 0x168   : > { %1330 = vmatprep.subr.bf16.mxu1 %v1599_v0 }
 0x169   : > { %v421_v22 = vpop.permute.xlu0 %420 }
 0x16a   : > { %v426_v23 = vsel %vm308_vm2, %v421_v22, 0 }
 0x16e   : > { %1321 = vmatmul.mubr.msk.bf16.vlgmr.msra.gmra.mxu1 %vm308_vm2, %v1768_v17 }
 0x16f   : > { %1331 = vmatpush3.bf16.xpose.msra.mxu1 %v426_v23  ;;  %1332 = vmatprep.mubr.msk.bf16.mxu1 %vm1600_vm0, %v1599_v0 }
 0x170   : > { %1342 = vmatprep.subr.bf16.mxu1 %v1599_v0 }
 0x176   : > { %1333 = vmatmul.mubr.msk.bf16.vlgmr.msra.gmra.mxu1 %vm308_vm2, %v419_v24 }
 0x177   : > { %1344 = vmatprep.mubr.msk.bf16.mxu1 %vm1600_vm0, %v1599_v0 }
 0x22e   : > { %v349_v25 = vpop.f32.mrf.mxu1 }
 0x22f   : > { %v355_v26 = vmul.f32 0.35355338, %v349_v25 }
 0x230   : > { %v1322_v27 = vpop.f32.mrf.mxu1 }
 0x231   : > { %v356_v28 = vsel %vm308_vm2, %v355_v26, -inf }
 0x232   : > { %357 = vmax.xlane.f32.xlu1 %v356_v28  ;;  %v352_v29 = vpop.f32.mrf.mxu1 }
 0x234   : > { %v1323_v30 = vpop.f32.mrf.mxu1 }
 0x236   : > { %v462_v31 = vpop.f32.mrf.mxu1 }
 0x237   : > { %v468_v32 = vmul.f32 0.35355338, %v462_v31  ;;  %v1253_v31 = vcombine.low %v1734_v3, %v1734_v3 }
 0x238   : > { %v1334_v33 = vpop.f32.mrf.mxu1 }
 0x239   : > { %v469_v34 = vsel %vm308_vm2, %v468_v32, -inf }
 0x23a   : > { %470 = vmax.xlane.f32.xlu0 %v469_v34  ;;  %v465_v35 = vpop.f32.mrf.mxu1 }
 0x23c   : > { %v1335_v36 = vpop.f32.mrf.mxu1 }
 0x2bb   : > { %v358_v37 = vpop.xlane.xlu1 %357 }
 0x2bc   : > { %v359_v38 = vsub.f32 %v355_v26, %v358_v37 }
 0x2be   : > { %v360_v39 = vmul.f32 1.442695, %v359_v38 }
 0x2c0   : > { %1486 = vpow2.f32 %v360_v39 }
 0x2c3   : > { %v471_v40 = vpop.xlane.xlu0 %470 }
 0x2c4   : > { %v472_v41 = vsub.f32 %v468_v32, %v471_v40 }
 0x2c6   : > { %v473_v42 = vmul.f32 1.442695, %v472_v41 }
 0x2c8   : > { %1488 = vpow2.f32 %v473_v42 }
 0x2cd   : > { %v1487_v43 = vpop.eup %1486 }
 0x2ce   : > { %v362_v44 = vsel %vm308_vm2, %v1487_v43, 0.0 }
 0x2cf   : > { %363 = vadd.xlane.f32.xlu0 %v362_v44 }
 0x2d5   : > { %v1489_v45 = vpop.eup %1488 }
 0x2d6   : > { %v475_v46 = vsel %vm308_vm2, %v1489_v45, 0.0 }
 0x2d7   : > { %476 = vadd.xlane.f32.xlu1 %v475_v46 }
 0x2e5   : > { %368 = vrot.lane.b32.xlu0 %v1768_v17, %s1604_s13 }
 0x2e8   : > { %481 = vrot.lane.b32.xlu1 %v1768_v17, %s1605_s14  ;;  %s226_s14 = sand.u32 1, %s1588_s19  }
 0x2e9   : > { %630 = vrot.lane.b32.xlu0 %v1768_v17, %s1606_s15  ;;  %s1242_s15 = sshll.u32 %s226_s14, 3  ;;  %s1152_s6 = scalar_lea.sflag [#allocation4], %s226_s14 }
 0x2ec   : > { %531 = vrot.lane.b32.xlu1 %v1251_v47, %s1607_s16 }
 0x2f0   : > { %628 = vrot.lane.b32.xlu1 %v1768_v17, %s1608_s17  ;;  %s228_s17 = scalar_lea.vmem [#allocation5], %s1242_s15 }
 0x358   : > { %v364_v48 = vpop.xlane.xlu0 %363 }
 0x359   : > { %1490 = vrcp.f32 %v364_v48 }
 0x35c   : > { %v369_v49 = vpop.permute.xlu0 %368 }
 0x35d   : > { %v375_v50 = vsel %vm373_vm3, %v369_v49, 0 }
 0x35e   : > { %1325 = vmatpush3.bf16.msra.mxu0 %v375_v50 }
 0x35f   : > { %1336 = vmatprep.subr.bf16.mxu0 %v1599_v0 }
 0x360   : > { %v477_v51 = vpop.xlane.xlu1 %476  ;;  %v631_v8 = vpop.permute.xlu0 %630 }
 0x361   : > { %1492 = vrcp.f32 %v477_v51  ;;  %v636_v16 = vsel %vm308_vm2, %v631_v8, 0 }
 0x364   : > { %v482_v52 = vpop.permute.xlu1 %481 }
 0x365   : > { %v487_v58 = vsel %vm373_vm3, %v482_v52, 0 }
 0x366   : > { %v1491_v53 = vpop.eup %1490 }
 0x367   : > { %v366_v54 = vmul.f32 %v1491_v53, %v1487_v43 }
 0x368   : > { %v532_v55 = vpop.permute.xlu1 %531 }
 0x369   : > { %v537_v56 = vsel %vm373_vm3, %v532_v55, 0  ;;  %v367_v57 = vpack.c.bf16 %v366_v54, %v366_v54 }
 0x36a   : > { %1343 = vmatpush3.bf16.msra.mxu1 %v537_v56 }
 0x36b   : > { %1327 = vmatmul.mubr.msk.bf16.vlgmr.msra.gmra.mxu0 %vm308_vm2, %v367_v57  ;;  %1354 = vmatprep.subr.bf16.mxu1 %v1599_v0 }
 0x36c   : > { %1337 = vmatpush3.bf16.msra.mxu0 %v487_v58  ;;  %1338 = vmatprep.mubr.msk.bf16.mxu0 %vm1600_vm0, %v1599_v0  ;;  %v629_v20 = vpop.permute.xlu1 %628 }
 0x36d   : > { %1348 = vmatprep.subr.bf16.mxu0 %v1599_v0 }
 0x36e   : > { %v1493_v59 = vpop.eup %1492 }
 0x36f   : > { %v479_v60 = vmul.f32 %v1493_v59, %v1489_v45 }
 0x371   : > { %v480_v61 = vpack.c.bf16 %v479_v60, %v479_v60 }
 0x373   : > { %1339 = vmatmul.mubr.msk.bf16.vlgmr.msra.gmra.mxu0 %vm308_vm2, %v480_v61 }
 0x374   : > { %1350 = vmatprep.mubr.msk.bf16.mxu0 %vm1600_vm0, %v1599_v0 }
 0x42b   : > { %v411_v62 = vpop.f32.mrf.mxu0 }
 0x42c   : > { %v417_v37 = vpack.c.bf16 %v411_v62, %v411_v62 }
 0x42d   : > { %v1328_v63 = vpop.f32.mrf.mxu0 }
 0x42e   : > { %v1257_v63 = vcombine.low %v1724_v1, %v1724_v1 }
 0x42f   : > { %v414_v4 = vpop.f32.mrf.mxu0 }
 0x431   : > { %v1329_v7 = vpop.f32.mrf.mxu0 }
 0x433   : > { %v523_v9 = vpop.f32.mrf.mxu0 }
 0x434   : > { %v529_v14 = vpack.c.bf16 %v523_v9, %v523_v9 }
 0x435   : > { %v1340_v15 = vpop.f32.mrf.mxu0 }
 0x436   : > { %1345 = vmatmul.mubr.msk.bf16.vlgmr.msra.gmra.mxu1 %vm308_vm2, %v529_v14 }
 0x437   : > { %1355 = vmatpush3.bf16.xpose.msra.mxu1 %v636_v16  ;;  %v526_v18 = vpop.f32.mrf.mxu0  ;;  %1356 = vmatprep.mubr.msk.bf16.mxu1 %vm1600_vm0, %v1599_v0 }
 0x438   : > { %1366 = vmatprep.subr.bf16.mxu1 %v1599_v0 }
 0x439   : > { %v1341_v19 = vpop.f32.mrf.mxu0 }
 0x43a   : > { %v1261_v19 = vcombine.low %v1729_v2, %v1729_v2 }
 0x43e   : > { %1357 = vmatmul.mubr.msk.bf16.vlgmr.msra.gmra.mxu1 %vm308_vm2, %v629_v20 }
 0x43f   : > { %1368 = vmatprep.mubr.msk.bf16.mxu1 %vm1600_vm0, %v1599_v0 }
 0x4f6   : > { %v1815_v21 = vpop.f32.mrf.mxu1 }
 0x4f8   : > { %v1346_v22 = vpop.f32.mrf.mxu1 }
 0x4fa   : > { %v576_v23 = vpop.f32.mrf.mxu1 }
 0x4fc   : > { %v1347_v24 = vpop.f32.mrf.mxu1 }
 0x4fe   : > { %v672_v25 = vpop.f32.mrf.mxu1 }
 0x4ff   : > { %v678_v26 = vmul.f32 0.35355338, %v672_v25 }
 0x500   : > { %v1358_v27 = vpop.f32.mrf.mxu1 }
 0x501   : > { %v679_v28 = vsel %vm308_vm2, %v678_v26, -inf }
 0x502   : > { %680 = vmax.xlane.f32.xlu0 %v679_v28  ;;  %v675_v29 = vpop.f32.mrf.mxu1 }
 0x504   : > { %v1359_v30 = vpop.f32.mrf.mxu1 }
 0x518   : > { %580 = vrot.lane.b32.xlu0 %v1253_v31, %s1607_s16 }
 0x51c   : > { %792 = vrot.lane.b32.xlu0 %v1768_v17, %s1609_s23  ;;  %s1165_s23 = sshll.u32 %s228_s17, 4  ;;  %s1166_s23 = int_to_ptr.vmem [resolvable:$true] %s1165_s23 }
 0x51d   : > { %s1532_s7 = scalar_lea.vmem %s1166_s23, 128  ;;  %p1539_p11 = scmp.lt.s32.totalorder %s1166_s23, %s1537_s9 }
 0x51e   : > { %p1533_p6 = scmp.ne.s32.totalorder %s1166_s23, %s1532_s7 }
 0x520   : > { %p1534_p9 = pnand %p1533_p6, %p1682_p5 }
 0x522   : > { %p1535_p10 = pneg %p1534_p9 }
 0x58b   : > { %v681_v32 = vpop.xlane.xlu0 %680 }
 0x58c   : > { %v682_v33 = vsub.f32 %v678_v26, %v681_v32  ;;  %v1264_v26 = vcombine.high %v1724_v1, %v1729_v2 }
 0x58e   : > { %v683_v34 = vmul.f32 1.442695, %v682_v33 }
 0x58f   : > { %v581_v35 = vpop.permute.xlu0 %580 }
 0x590   : > { %1494 = vpow2.f32 %v683_v34  ;;  %v586_v36 = vsel %vm373_vm3, %v581_v35, 0 }
 0x591   : > { %1349 = vmatpush3.bf16.msra.mxu0 %v586_v36 }
 0x592   : > { %1360 = vmatprep.subr.bf16.mxu0 %v1599_v0 }
 0x593   : > { %v793_v45 = vpop.permute.xlu0 %792 }
 0x594   : > { %1351 = vmatmul.mubr.msk.bf16.vlgmr.msra.gmra.mxu0 %vm308_vm2, %v417_v37  ;;  %v798_v47 = vsel %vm308_vm2, %v793_v45, 0 }
 0x595   : > { %1362 = vmatprep.mubr.msk.bf16.mxu0 %vm1600_vm0, %v1599_v0 }
 0x59d   : > { %v1495_v38 = vpop.eup %1494 }
 0x59e   : > { %v685_v39 = vsel %vm308_vm2, %v1495_v38, 0.0 }
 0x59f   : > { %686 = vadd.xlane.f32.xlu1 %v685_v39 }
 0x5b0   : > { %691 = vrot.lane.b32.xlu1 %v1768_v17, %s1610_s25 }
 0x5b4   : > { %790 = vrot.lane.b32.xlu1 %v1768_v17, %s1611_s26 }
 0x628   : > { %v687_v40 = vpop.xlane.xlu1 %686 }
 0x629   : > { %1496 = vrcp.f32 %v687_v40 }
 0x62c   : > { %v692_v41 = vpop.permute.xlu1 %691 }
 0x62d   : > { %v697_v42 = vsel %vm373_vm3, %v692_v41, 0 }
 0x62e   : > { %1361 = vmatpush3.bf16.msra.mxu0 %v697_v42 }
 0x62f   : > { %1372 = vmatprep.subr.bf16.mxu0 %v1599_v0 }
 0x630   : > { %v791_v48 = vpop.permute.xlu1 %790 }
 0x636   : > { %v1497_v43 = vpop.eup %1496 }
 0x637   : > { %v689_v44 = vmul.f32 %v1497_v43, %v1495_v38  ;;  %v1868_v38 = vld [vmem:[#allocation2] sm:$0x3f] }
 0x639   : > { %v690_v46 = vpack.c.bf16 %v689_v44, %v689_v44 }
 0x63b   : > { %1363 = vmatmul.mubr.msk.bf16.vlgmr.msra.gmra.mxu0 %vm308_vm2, %v690_v46 }
 0x63c   : > { %1373 = vmatpush3.bf16.xpose.msra.mxu0 %v798_v47  ;;  %1374 = vmatprep.mubr.msk.bf16.mxu0 %vm1600_vm0, %v1599_v0 }
 0x63d   : > { %1384 = vmatprep.subr.bf16.mxu0 %v1599_v0 }
 0x643   : > { %1375 = vmatmul.mubr.msk.bf16.vlgmr.msra.gmra.mxu0 %vm308_vm2, %v791_v48 }
 0x644   : > { %1386 = vmatprep.mubr.msk.bf16.mxu0 %vm1600_vm0, %v1599_v0 }
 0x654   : > { %v622_v49 = vpop.f32.mrf.mxu0 }
 0x655   : > { %v623_v29 = vadd.f32 %v622_v49, %v1815_v21  ;;  %v955_v21 = vrot.slane %v1868_v38, %v245_v11  ;;  %v1263_v11 = vcombine.high %v1734_v3, %v1741_v5 }
 0x656   : > { %v1352_v50 = vpop.f32.mrf.mxu0 }
 0x658   : > { %v625_v51 = vpop.f32.mrf.mxu0 }
 0x65a   : > { %v1353_v52 = vpop.f32.mrf.mxu0 }
 0x65b   : > { %v1482_v52 = vld [vmem:[%s1949_s3 + $0x18] sm:$0xff]  }
 0x6fb   : > { %v733_v53 = vpop.f32.mrf.mxu0 }
 0x6fc   : > { %v739_v15 = vpack.c.bf16 %v733_v53, %v733_v53 }
 0x6fd   : > { %v1364_v54 = vpop.f32.mrf.mxu0 }
 0x6fe   : > { %v1483_v54 = vld [vmem:[%s1949_s3 + $0x10] sm:$0xff]  }
 0x6ff   : > { %v736_v55 = vpop.f32.mrf.mxu0 }
 0x700   : > { %v974_v55 = vsub.s32 2, %v1754_v10 }
 0x701   : > { %v1365_v56 = vpop.f32.mrf.mxu0 }
 0x702   : > { %v975_v56 = vrot.slane %v1868_v38, %v974_v55 }
 0x703   : > { %v834_v57 = vpop.f32.mrf.mxu0 }
 0x704   : > { %v840_v58 = vmul.f32 0.35355338, %v834_v57 }
 0x705   : > { %v1376_v59 = vpop.f32.mrf.mxu0 }
 0x706   : > { %v841_v60 = vsel %vm308_vm2, %v840_v58, -inf }
 0x707   : > { %842 = vmax.xlane.f32.xlu0 %v841_v60  ;;  %v837_v61 = vpop.f32.mrf.mxu0 }
 0x709   : > { %v1377_v62 = vpop.f32.mrf.mxu0 }
 0x71d   : > { %741 = vrot.lane.b32.xlu0 %v1257_v63, %s1607_s16  ;;  %v1484_v63 = vld [vmem:[%s1949_s3 + $0x8] sm:$0xff]  }
 0x721   : > { %903 = vrot.lane.b32.xlu0 %v1261_v19, %s1607_s16 }
 0x790   : > { %v843_v4 = vpop.xlane.xlu0 %842 }
 0x791   : > { %v844_v7 = vsub.f32 %v840_v58, %v843_v4  ;;  %v1485_v4 = vld [vmem:[%s1949_s3] sm:$0xff]  }
 0x793   : > { %v845_v8 = vmul.f32 1.442695, %v844_v7 }
 0x794   : > { %v742_v9 = vpop.permute.xlu0 %741 }
 0x795   : > { %1498 = vpow2.f32 %v845_v8  ;;  %v747_v14 = vsel %vm373_vm3, %v742_v9, 0 }
 0x796   : > { %1367 = vmatpush3.bf16.msra.mxu1 %v747_v14 }
 0x797   : > { %1378 = vmatprep.subr.bf16.mxu1 %v1599_v0 }
 0x799   : > { %1369 = vmatmul.mubr.msk.bf16.vlgmr.msra.gmra.mxu1 %vm308_vm2, %v739_v15 }
 0x79a   : > { %1380 = vmatprep.mubr.msk.bf16.mxu1 %vm1600_vm0, %v1599_v0 }
 0x7a2   : > { %v1499_v16 = vpop.eup %1498 }
 0x7a3   : > { %v847_v18 = vsel %vm308_vm2, %v1499_v16, 0.0 }
 0x7a4   : > { %848 = vadd.xlane.f32.xlu1 %v847_v18 }
 0x7b5   : > { %853 = vrot.lane.b32.xlu1 %v1768_v17, %s1612_s30  ;;  %v904_v17 = vpop.permute.xlu0 %903 }
 0x7b6   : > { %v909_v28 = vsel %vm373_vm3, %v904_v17, 0 }
 0x7b7   : > { %1385 = vmatpush3.bf16.msra.mxu0 %v909_v28 }
 0x7b8   : > { %1398 = vmatprep.subr.bf16.mxu0 %v1599_v0 }
 0x82d   : > { %v849_v20 = vpop.xlane.xlu1 %848 }
 0x82e   : > { %1500 = vrcp.f32 %v849_v20 }
 0x831   : > { %v854_v22 = vpop.permute.xlu1 %853 }
 0x832   : > { %v859_v23 = vsel %vm373_vm3, %v854_v22, 0 }
 0x833   : > { %1379 = vmatpush3.bf16.msra.mxu1 %v859_v23 }
 0x834   : > { %1390 = vmatprep.subr.bf16.mxu1 %v1599_v0 }
 0x83b   : > { %v1501_v24 = vpop.eup %1500 }
 0x83c   : > { %v851_v25 = vmul.f32 %v1501_v24, %v1499_v16 }
 0x83e   : > { %v852_v27 = vpack.c.bf16 %v851_v25, %v851_v25 }
 0x840   : > { %1381 = vmatmul.mubr.msk.bf16.vlgmr.msra.gmra.mxu1 %vm308_vm2, %v852_v27 }
 0x841   : > { %1391 = vmatpush3.bf16.msra.mxu1 %v1264_v26  ;;  %1394 = vmatprep.mubr.msk.bf16.mxu1 %vm1600_vm0, %v1599_v0 }
 0x842   : > { %1392 = vmatprep.subr.bf16.mxu1 %v1599_v0 }
 0x845   : > { %1393 = vmatpush3.bf16.msra.mxu1 %v1263_v11 }
 0x859   : > { %v783_v30 = vpop.f32.mrf.mxu1 }
 0x85a   : > { %v789_v31 = vadd.f32 %v783_v30, %v623_v29 }
 0x85b   : > { %v1370_v1 = vpop.f32.mrf.mxu1 }
 0x85d   : > { %v786_v2 = vpop.f32.mrf.mxu1 }
 0x85f   : > { %v1371_v32 = vpop.f32.mrf.mxu1 }
 0x900   : > { %v895_v33 = vpop.f32.mrf.mxu1 }
 0x901   : > { %v901_v34 = vpack.c.bf16 %v895_v33, %v895_v33 }
 0x902   : > { %v1382_v35 = vpop.f32.mrf.mxu1 }
 0x903   : > { %1387 = vmatmul.mubr.msk.bf16.vlgmr.msra.gmra.mxu0 %vm308_vm2, %v901_v34  ;;  %v1142_v35 = vsub.s32 4, %v1754_v10 }
 0x904   : > { %v898_v36 = vpop.f32.mrf.mxu1  ;;  %1406 = vmatprep.mubr.msk.bf16.mxu0 %vm1600_vm0, %v1599_v0  ;;  %1399 = vmatpush3.bf16.msra.mxu0 %v1482_v52 }
 0x905   : > { %1400 = vmatprep.subr.bf16.mxu0 %v1599_v0  ;;  %v1147_v36 = vsub.s32 5, %v1754_v10 }
 0x906   : > { %v1383_v37 = vpop.f32.mrf.mxu1 }
 0x907   : > { %v1143_v37 = vrot.slane %v1868_v38, %v1142_v35 }
 0x908   : > { %1401 = vmatpush3.bf16.msra.mxu0 %v1483_v54 }
 0x909   : > { %1402 = vmatprep.subr.bf16.mxu0 %v1599_v0 }
 0x90c   : > { %1403 = vmatpush3.bf16.msra.mxu0 %v1484_v63 }
 0x90d   : > { %1404 = vmatprep.subr.bf16.mxu0 %v1599_v0 }
 0x910   : > { %1405 = vmatpush3.bf16.msra.mxu0 %v1485_v4 }
 0x9c3   : > { %v945_v39 = vpop.f32.mrf.mxu0 }
 0x9c4   : > { %v951_v40 = vadd.f32 %v945_v39, %v789_v31 }
 0x9c5   : > { %v1388_v41 = vpop.f32.mrf.mxu0 }
 0x9c6   : > { %v956_v42 = vadd.f32 %v955_v21, %v951_v40  ;;  %v1148_v40 = vrot.slane %v1868_v38, %v1147_v36 }
 0x9c7   : > { %v948_v43 = vpop.f32.mrf.mxu0 }
 0x9c8   : > { %v957_v44 = vadd.f32 %v956_v42, %v1743_v6  ;;  %v985_v6 = vsub.s32 1, %v1754_v10 }
 0x9c9   : > { %v1389_v45 = vpop.f32.mrf.mxu0 }
 0x9ca   : > { %v958_v46 = vsel %vm260_vm1, %v957_v44, 0.0  ;;  %v986_v53 = vrot.slane %v1760_v12, %v985_v6  ;;  %v979_v12 = vsub.s32 3, %v1754_v10  ;;  %v1057_v0 = vrot.slane %v1868_v38, %v985_v6 }
 0x9cb   : > { %959 = vadd.xlane.f32.xlu1 %v958_v46 }
 0x9cc   : > { %v980_v59 = vrot.slane %v1868_v38, %v979_v12 }
 0x9dc   : > { %997 = vrot.lane.b32.xlu1 %v986_v53, %s1607_s16 }
 0xa54   : > { %v960_v47 = vpop.xlane.xlu1 %959 }
 0xa55   : > { %v962_v48 = vmul.f32 0.03125, %v960_v47 }
 0xa57   : > { %v963_v49 = vsub.f32 %v957_v44, %v962_v48 }
 0xa58   : > { %v998_v8 = vpop.permute.xlu1 %997 }
 0xa59   : > { %v964_v50 = vmul.f32 %v963_v49, %v963_v49 }
 0xa5b   : > { %v965_v51 = vsel %vm260_vm1, %v964_v50, 0.0 }
 0xa5c   : > { %966 = vadd.xlane.f32.xlu0 %v965_v51 }
 0xa72   : > { %995 = vrot.lane.b32.xlu0 %v1765_v13, %s1607_s16  ;;  %s1272_s16 = sshll.u32 %s1665_s22, 7  ;;  %s1538_s22 = scalar_lea.vmem %s1537_s9, 256 }
 0xa73   : > { %s1163_s30 = scalar_lea.hbm %s1951_s5, %s1272_s16  ;;  %p1540_p12 = scmp.lt.s32.totalorder %s1538_s22, %s1532_s7 }
 0xa75   : > { %p1541_p13 = por %p1540_p12, %p1539_p11 }
 0xa77   : > { %p1542_p0 = pnand %p1541_p13, %p1535_p10 }
 0xae5   : > { %v967_v3 = vpop.xlane.xlu0 %966 }
 0xae6   : > { %v968_v5 = vmul.f32 0.03125, %v967_v3 }
 0xae8   : > { %v969_v13 = vadd.f32 1e-05, %v968_v5 }
 0xae9   : > { %v996_v7 = vpop.permute.xlu0 %995 }
 0xaea   : > { %1502 = vrsqrt.f32 %v969_v13  ;;  %v999_v9 = vsel %vm260_vm1, %v996_v7, %v998_v8 }
 0xaf7   : > { %v1503_v57 = vpop.eup %1502 }
 0xaf8   : > { %v971_v58 = vmul.f32 %v1503_v57, %v963_v49 }
 0xafa   : > { %v976_v60 = vmul.f32 %v975_v56, %v971_v58 }
 0xafc   : > { %v981_v61 = vadd.f32 %v980_v59, %v976_v60 }
 0xafe   : > { %v982_v62 = vpack.c.bf16 %v981_v61, %v981_v61 }
 0xb00   : > { %1395 = vmatmul.mubr.msk.bf16.vlgmr.msra.gmra.mxu1 %vm260_vm1, %v982_v62 }
 0xbc0   : > { %v1038_v14 = vpop.f32.mrf.mxu1 }
 0xbc1   : > { %v1039_v15 = vadd.f32 %v1038_v14, %v999_v9 }
 0xbc2   : > { %v1396_v16 = vpop.f32.mrf.mxu1 }
 0xbc3   : > { %v1044_v18 = vmax.f32 %v1039_v15, 0.0 }
 0xbc4   : > { %v1041_v19 = vpop.f32.mrf.mxu1 }
 0xbc5   : > { %v1045_v20 = vpack.c.bf16 %v1044_v18, %v1044_v18 }
 0xbc6   : > { %v1397_v22 = vpop.f32.mrf.mxu1 }
 0xbc7   : > { %1407 = vmatmul.mubr.msk.bf16.vlgmr.msra.gmra.mxu0 %vm1082_vm4, %v1045_v20 }
 0xc87   : > { %v1120_v23 = vpop.f32.mrf.mxu0 }
 0xc88   : > { %v1121_v24 = vadd.f32 %v1120_v23, %v1057_v0 }
 0xc89   : > { %v1408_v25 = vpop.f32.mrf.mxu0 }
 0xc8a   : > { %v1126_v26 = vadd.f32 %v1121_v24, %v981_v61 }
 0xc8b   : > { %v1123_v27 = vpop.f32.mrf.mxu0 }
 0xc8c   : > { %v1127_v17 = vsel %vm260_vm1, %v1126_v26, 0.0 }
 0xc8d   : > { %1128 = vadd.xlane.f32.xlu1 %v1127_v17  ;;  %v1409_v28 = vpop.f32.mrf.mxu0 }
 0xd16   : > { %v1129_v29 = vpop.xlane.xlu1 %1128 }
 0xd17   : > { %v1130_v30 = vmul.f32 0.03125, %v1129_v29 }
 0xd19   : > { %v1131_v31 = vsub.f32 %v1126_v26, %v1130_v30 }
 0xd1b   : > { %v1132_v1 = vmul.f32 %v1131_v31, %v1131_v31 }
 0xd1d   : > { %v1133_v2 = vsel %vm260_vm1, %v1132_v1, 0.0 }
 0xd1e   : > { %1134 = vadd.xlane.f32.xlu0 %v1133_v2 }
 0xda7   : > { %v1135_v32 = vpop.xlane.xlu0 %1134 }
 0xda8   : > { %v1136_v33 = vmul.f32 0.03125, %v1135_v32 }
 0xdaa   : > { %v1137_v34 = vadd.f32 1e-05, %v1136_v33 }
 0xdac   : > { %1504 = vrsqrt.f32 %v1137_v34 }
 0xdb9   : > { %v1505_v21 = vpop.eup %1504 }
 0xdba   : > { %v1139_v39 = vmul.f32 %v1505_v21, %v1131_v31 }
 0xdbc   : > { %v1144_v41 = vmul.f32 %v1143_v37, %v1139_v39 }
 0xdbe   : > { %v1149_v42 = vadd.f32 %v1148_v40, %v1144_v41 }
 0xdc0   : > { %1150 = vst.msk [vmem:[%s228_s17] sm:$0xff] %vm260_vm1, %v1149_v42 }
 0xdc1   : > { %1545 = shalt.err (!%p1542_p0)
}
 0xdc2   : > { %s1546_s10 = scalar_lea.hbm %s1163_s30, 128  ;;  %s1550_s13 = scalar_lea.hbm %s1951_s5, 256 }
 0xdc3   : > { %p1547_p1 = scmp.ne.s32.totalorder %s1163_s30, %s1546_s10  ;;  %p1551_p4 = scmp.lt.s32.totalorder %s1163_s30, %s1951_s5 }
 0xdc4   : > { %p1552_p7 = scmp.lt.s32.totalorder %s1550_s13, %s1546_s10 }
 0xdc5   : > { %p1548_p2 = pnand %p1547_p1, %p1682_p5 }
 0xdc6   : > { %p1553_p8 = por %p1552_p7, %p1551_p4 }
 0xdc7   : > { %p1549_p3 = pneg %p1548_p2 }
 0xdc9   : > { %p1554_p6 = pnand %p1553_p8, %p1549_p3 }
 0xdcb   : > { %1557 = shalt.err (!%p1554_p6)
}
 0xdcc   : > { %1414 = dma.vmem_to_hbm [thread:$0]  (%p1682_p5), %s1166_s23, 128, %s1163_s30, %s1152_s6  }
 0xdcd PF: > { %p1426_p9 = scmp.ge.s32.totalorder %s1596_s21, 2  ;;  %s1177_s16 = sand.u32 1, %s1584_s18  }
 0xdce   : > { %p1955_p10 = scmp.ne.s32.totalorder %s1953_s29, 0  ;;  %s1178_s17 = scalar_lea.sflag [#allocation4], %s1177_s16 }
 0xdd0   : > { %p1421_p11 = pnand %p1426_p9, %p1955_p10 }
 0xdd2   : > { %p1422_p12 = pneg %p1421_p11 }
 0xdd4   : > { %1579 = dma.done.wait (%p1422_p12), %s1178_s17, 128  }
 0xdd5   : > { %1581 = vsyncadd (%p1422_p12), %s1178_s17, 4294967168  ;;  %p16_p13 = scmp.ge.s32.totalorder %s1669_s24, 4   ;;  %s1956_s18 = smov %s1588_s19 }
 0xdd6   : > { %s1957_s19 = smov %s1592_s20  ;;  %s1958_s20 = smov %s1680_s27 }
 0xdd7   : > { %s1959_s21 = smov %s1669_s24  ;;  %18 = sbr.rel (!%p16_p13) target bundleno = 4 (0x4), region = 80 }
 0xddc   :  { %1183 = vsyncpa [#allocation3], 1 }
 0xddd   :  { %1185 = vsyncpa [#allocation3 + $0x1], 1 }
 0xdde   :  { %1186 = vsyncpa [#allocation4], 1 }
 0xddf   :  { %1188 = vsyncpa [#allocation4 + $0x1], 1 }

</bundles_post_ra>
